<compile_context>
chip_gen: v7x
topology: tpu7x:2x2x1
jax: 0.10.0
libtpu: 0.0.40
codegen_flags: <defaults>
</compile_context>

<pallas_src>
import functools
import math

import jax
import jax.numpy as jnp
import numpy as np
from jax.experimental import pallas as pl
from jax.experimental.pallas import tpu as pltpu

LN_EPS = 1e-5  # torch.nn.LayerNorm default eps


def _layernorm(h, w, b):
    mu = jnp.mean(h, axis=-1, keepdims=True)
    var = jnp.mean((h - mu) ** 2, axis=-1, keepdims=True)
    return (h - mu) * jax.lax.rsqrt(var + LN_EPS) * w + b


def block_kernel(x_q_ref, x_kv_ref, mask_ref,
                 ln1w, ln1b, wq, bq, wkv, bkv, w_oc, b_oc,
                 ln2w, ln2b, w1, b1, w2, b2,
                 o_ref, *, n_head):
    f32 = jnp.float32
    cdt = wq.dtype                       # matmul-operand dtype (bfloat16)

    xq = x_q_ref[0].astype(f32)          # (TQ, E)  query / residual tile
    xkv = x_kv_ref[0].astype(f32)        # (T,  E)  full sequence for K/V
    TQ, E = xq.shape
    T = xkv.shape[0]
    hd = E // n_head

    # ---- attention branch ---------------------------------------------------
    hq = _layernorm(xq, ln1w[...], ln1b[...]).astype(cdt)
    hkv = _layernorm(xkv, ln1w[...], ln1b[...]).astype(cdt)

    # 1/sqrt(hd) is already folded into wq / bq on the host.
    q = jnp.dot(hq, wq[...], preferred_element_type=f32) + bq[...]      # (TQ, E)
    kv = jnp.dot(hkv, wkv[...], preferred_element_type=f32) + bkv[...]  # (T, 2E)
    k = kv[:, :E]
    v = kv[:, E:]

    # Head-batched attention (no per-head loop, no concatenate).
    q3 = q.reshape(TQ, n_head, hd).transpose(1, 0, 2).astype(cdt)   # (H, TQ, hd)
    k3 = k.reshape(T, n_head, hd).transpose(1, 0, 2).astype(cdt)    # (H, T,  hd)
    v3 = v.reshape(T, n_head, hd).transpose(1, 0, 2).astype(cdt)    # (H, T,  hd)

    s = jnp.einsum('hqd,hkd->hqk', q3, k3,
                   preferred_element_type=f32)                      # (H, TQ, T)
    # PyTorch float attn_mask semantics: the tril(ones) mask is ADDED to logits.
    s = s + mask_ref[...][None, :, :]
    s = s - jnp.max(s, axis=-1, keepdims=True)
    p = jnp.exp(s)
    p = p * pl.reciprocal(jnp.sum(p, axis=-1, keepdims=True), approx=True)

    ctx = jnp.einsum('hqk,hkd->hqd', p.astype(cdt), v3,
                     preferred_element_type=f32)                    # (H, TQ, hd)
    attn = ctx.transpose(1, 0, 2).reshape(TQ, E)                    # (TQ, E)

    # out_proj and c_proj folded into a single linear (host precompute).
    y = jnp.dot(attn.astype(cdt), w_oc[...], preferred_element_type=f32) + b_oc[...]
    x1 = xq + y                                                     # residual 1 (f32)

    # ---- MLP branch ---------------------------------------------------------
    h2 = _layernorm(x1, ln2w[...], ln2b[...]).astype(cdt)
    m = jnp.dot(h2, w1[...], preferred_element_type=f32) + b1[...]
    m = 0.5 * m * (1.0 + jax.lax.erf(m * (1.0 / math.sqrt(2.0))))   # exact GELU (f32)
    m = jnp.dot(m.astype(cdt), w2[...], preferred_element_type=f32) + b2[...]

    o_ref[0] = (x1 + m).astype(o_ref.dtype)                         # residual 2


def _pick_tq(T):
    """Query-tile length: bounds the (H, TQ, T) score slab and (TQ, 4E) MLP temp."""
    if T <= 128:
        return T
    for cand in (128, 256, 64, 32, 16, 8):
        if T % cand == 0:
            return cand
    return T


def block_forward(x, params, n_head):
    B, T, E = x.shape
    assert E % n_head == 0
    TQ = _pick_tq(T)
    num_q = T // TQ

    weight_keys = ("ln1_w", "ln1_b", "wq", "bq", "wkv", "bkv", "w_oc", "b_oc",
                   "ln2_w", "ln2_b", "w1", "b1", "w2", "b2")
    weights = [params[k] for k in weight_keys]

    def full_spec(arr):
        nd = arr.ndim
        return pl.BlockSpec(arr.shape, lambda b, qi, _nd=nd: (0,) * _nd)

    in_specs = [
        pl.BlockSpec((1, TQ, E), lambda b, qi: (b, qi, 0)),   # query / residual tile
        pl.BlockSpec((1, T, E), lambda b, qi: (b, 0, 0)),     # full sequence for K/V
        pl.BlockSpec((TQ, T), lambda b, qi: (qi, 0)),         # float mask tile
    ] + [full_spec(w) for w in weights]

    return pl.pallas_call(
        functools.partial(block_kernel, n_head=n_head),
        out_shape=jax.ShapeDtypeStruct((B, T, E), x.dtype),
        grid=(B, num_q),
        in_specs=in_specs,
        out_specs=pl.BlockSpec((1, TQ, E), lambda b, qi: (b, qi, 0)),
        compiler_params=pltpu.CompilerParams(
            dimension_semantics=("parallel", "parallel"),
            vmem_limit_bytes=48 * 1024 * 1024),
    )(x, x, params["mask"], *weights)


def prepare_kernel_params(raw, n_head, compute_dtype=jnp.bfloat16):
    """Host-side weight prep: fuse K|V, fold out_proj@c_proj, fold 1/sqrt(hd), cast."""
    f32 = jnp.float32
    E = raw["wq"].shape[0]
    scale = 1.0 / math.sqrt(E // n_head)
    return dict(
        ln1_w=raw["ln1_w"].astype(f32), ln1_b=raw["ln1_b"].astype(f32),
        wq=(raw["wq"] * scale).astype(compute_dtype),
        bq=(raw["bq"] * scale).astype(f32),
        wkv=jnp.concatenate([raw["wk"], raw["wv"]], axis=1).astype(compute_dtype),
        bkv=jnp.concatenate([raw["bk"], raw["bv"]], axis=1).astype(f32),
        w_oc=(raw["wo"] @ raw["wc"]).astype(compute_dtype),
        b_oc=(raw["bo"] @ raw["wc"] + raw["bc"]).astype(f32),
        ln2_w=raw["ln2_w"].astype(f32), ln2_b=raw["ln2_b"].astype(f32),
        w1=raw["w1"].astype(compute_dtype), b1=raw["b1"].astype(f32),
        w2=raw["w2"].astype(compute_dtype), b2=raw["b2"].astype(f32),
        mask=raw["mask"].astype(f32),
    )


def ref_block(x, p, n_head):
    """Pure-JAX f32 reference with the PyTorch module's semantics."""
    def ln(h, w, b):
        mu = h.mean(-1, keepdims=True)
        var = ((h - mu) ** 2).mean(-1, keepdims=True)
        return (h - mu) * jax.lax.rsqrt(var + LN_EPS) * w + b

    B, T, E = x.shape
    hd = E // n_head
    h = ln(x, p["ln1_w"], p["ln1_b"])
    q = h @ p["wq"] + p["bq"]
    k = h @ p["wk"] + p["bk"]
    v = h @ p["wv"] + p["bv"]
    qh = q.reshape(B, T, n_head, hd).transpose(0, 2, 1, 3)
    kh = k.reshape(B, T, n_head, hd).transpose(0, 2, 1, 3)
    vh = v.reshape(B, T, n_head, hd).transpose(0, 2, 1, 3)
    s = (qh @ kh.transpose(0, 1, 3, 2)) / math.sqrt(hd) + p["mask"]
    pa = jax.nn.softmax(s, axis=-1)
    o = (pa @ vh).transpose(0, 2, 1, 3).reshape(B, T, E)
    y = o @ p["wo"] + p["bo"]
    y = y @ p["wc"] + p["bc"]
    x1 = x + y
    h2 = ln(x1, p["ln2_w"], p["ln2_b"])
    m = h2 @ p["w1"] + p["b1"]
    m = 0.5 * m * (1.0 + jax.lax.erf(m * (1.0 / math.sqrt(2.0))))
    m = m @ p["w2"] + p["b2"]
    return x1 + m


def _make_raw_params(key, T, E):
    ks = jax.random.split(key, 12)
    f32 = jnp.float32

    def w(k, shape):
        return (0.02 * jax.random.normal(k, shape)).astype(f32)

    return dict(
        ln1_w=jnp.ones((1, E), f32), ln1_b=jnp.zeros((1, E), f32),
        # in_proj (Wq/Wk/Wv) of nn.MultiheadAttention, pre-transposed to (E, E)
        wq=w(ks[0], (E, E)), wk=w(ks[1], (E, E)), wv=w(ks[2], (E, E)),
        bq=w(ks[3], (1, E)), bk=w(ks[4], (1, E)), bv=w(ks[5], (1, E)),
        # MultiheadAttention out_proj and the extra c_proj Linear
        wo=w(ks[6], (E, E)), bo=w(ks[7], (1, E)),
        wc=w(ks[8], (E, E)), bc=w(ks[9], (1, E)),
        ln2_w=jnp.ones((1, E), f32), ln2_b=jnp.zeros((1, E), f32),
        # MLP: Linear(E, 4E) -> GELU -> Linear(4E, E)
        w1=w(ks[10], (E, 4 * E)), b1=jnp.zeros((1, 4 * E), f32),
        w2=w(ks[11], (4 * E, E)), b2=jnp.zeros((1, E), f32),
        # float causal mask buffer (tril of ones) — ADDED to logits (PyTorch semantics)
        mask=jnp.tril(jnp.ones((T, T), f32)),
    ), ks


def _run_case(key, B, T, E, H, tol):
    raw, ks = _make_raw_params(key, T, E)
    x = jax.random.normal(jax.random.fold_in(key, 99), (B, T, E), jnp.float32)

    kp = prepare_kernel_params(raw, H)
    out = jax.block_until_ready(block_forward(x, kp, H))
    ref = jax.block_until_ready(ref_block(x, raw, H))
    np.testing.assert_allclose(np.asarray(out), np.asarray(ref), rtol=tol, atol=tol)


if __name__ == "__main__":
    base = jax.random.PRNGKey(0)
    # Tiny demo config (matches the original small shapes).
    _run_case(jax.random.fold_in(base, 0), B=2, T=8, E=32, H=4, tol=2e-2)
    # Lane-aligned config exercising the query-tiling path (TQ=128, num_q=2).
    _run_case(jax.random.fold_in(base, 1), B=2, T=256, E=128, H=4, tol=2e-2)
    print("KERNEL_OK")
</pallas_src>

<mosaic_0001>
module attributes {stable_mosaic.version = 11 : i64} {
  func.func @block_kernel(%arg0: i32, %arg1: i32, %arg2: memref<1x8x32xf32, #tpu.memory_space<vmem>>, %arg3: memref<1x8x32xf32, #tpu.memory_space<vmem>>, %arg4: memref<8x8xf32, #tpu.memory_space<vmem>>, %arg5: memref<1x32xf32, #tpu.memory_space<vmem>>, %arg6: memref<1x32xf32, #tpu.memory_space<vmem>>, %arg7: memref<32x32xbf16, #tpu.memory_space<vmem>>, %arg8: memref<1x32xf32, #tpu.memory_space<vmem>>, %arg9: memref<32x64xbf16, #tpu.memory_space<vmem>>, %arg10: memref<1x64xf32, #tpu.memory_space<vmem>>, %arg11: memref<32x32xbf16, #tpu.memory_space<vmem>>, %arg12: memref<1x32xf32, #tpu.memory_space<vmem>>, %arg13: memref<1x32xf32, #tpu.memory_space<vmem>>, %arg14: memref<1x32xf32, #tpu.memory_space<vmem>>, %arg15: memref<32x128xbf16, #tpu.memory_space<vmem>>, %arg16: memref<1x128xf32, #tpu.memory_space<vmem>>, %arg17: memref<128x32xbf16, #tpu.memory_space<vmem>>, %arg18: memref<1x32xf32, #tpu.memory_space<vmem>>, %arg19: memref<1x8x32xf32, #tpu.memory_space<vmem>>) attributes {dimension_semantics = [#tpu.dimension_semantics<parallel>, #tpu.dimension_semantics<parallel>], iteration_bounds = array<i64: 2, 1>, scalar_prefetch = 0 : i64, scratch_operands = 0 : i64, tpu.core_type = #tpu.core_type<tc>, window_params = [{transform_indices = @transform_0, window_bounds = array<i64: 1, 8, 32>}, {transform_indices = @transform_1, window_bounds = array<i64: 1, 8, 32>}, {transform_indices = @transform_2, window_bounds = array<i64: 8, 8>}, {pipeline_mode = #tpu.pipeline_mode<synchronous>, transform_indices = @transform_3, window_bounds = array<i64: 1, 32>}, {pipeline_mode = #tpu.pipeline_mode<synchronous>, transform_indices = @transform_4, window_bounds = array<i64: 1, 32>}, {pipeline_mode = #tpu.pipeline_mode<synchronous>, transform_indices = @transform_5, window_bounds = array<i64: 32, 32>}, {pipeline_mode = #tpu.pipeline_mode<synchronous>, transform_indices = @transform_6, window_bounds = array<i64: 1, 32>}, {pipeline_mode = #tpu.pipeline_mode<synchronous>, transform_indices = @transform_7, window_bounds = array<i64: 32, 64>}, {pipeline_mode = #tpu.pipeline_mode<synchronous>, transform_indices = @transform_8, window_bounds = array<i64: 1, 64>}, {pipeline_mode = #tpu.pipeline_mode<synchronous>, transform_indices = @transform_9, window_bounds = array<i64: 32, 32>}, {pipeline_mode = #tpu.pipeline_mode<synchronous>, transform_indices = @transform_10, window_bounds = array<i64: 1, 32>}, {pipeline_mode = #tpu.pipeline_mode<synchronous>, transform_indices = @transform_11, window_bounds = array<i64: 1, 32>}, {pipeline_mode = #tpu.pipeline_mode<synchronous>, transform_indices = @transform_12, window_bounds = array<i64: 1, 32>}, {pipeline_mode = #tpu.pipeline_mode<synchronous>, transform_indices = @transform_13, window_bounds = array<i64: 32, 128>}, {pipeline_mode = #tpu.pipeline_mode<synchronous>, transform_indices = @transform_14, window_bounds = array<i64: 1, 128>}, {pipeline_mode = #tpu.pipeline_mode<synchronous>, transform_indices = @transform_15, window_bounds = array<i64: 128, 32>}, {pipeline_mode = #tpu.pipeline_mode<synchronous>, transform_indices = @transform_16, window_bounds = array<i64: 1, 32>}, {transform_indices = @transform_17, window_bounds = array<i64: 1, 8, 32>}]} {
    %c0 = arith.constant 0 : index
    %c0_0 = arith.constant 0 : index
    %c0_1 = arith.constant 0 : index
    %0 = vector.load %arg2[%c0, %c0_0, %c0_1] : memref<1x8x32xf32, #tpu.memory_space<vmem>>, vector<1x8x32xf32>
    %1 = vector.shape_cast %0 : vector<1x8x32xf32> to vector<8x32xf32>
    %c0_2 = arith.constant 0 : index
    %c0_3 = arith.constant 0 : index
    %c0_4 = arith.constant 0 : index
    %2 = vector.load %arg3[%c0_2, %c0_3, %c0_4] : memref<1x8x32xf32, #tpu.memory_space<vmem>>, vector<1x8x32xf32>
    %3 = vector.shape_cast %2 : vector<1x8x32xf32> to vector<8x32xf32>
    %c0_5 = arith.constant 0 : index
    %c0_6 = arith.constant 0 : index
    %4 = vector.load %arg5[%c0_5, %c0_6] : memref<1x32xf32, #tpu.memory_space<vmem>>, vector<1x32xf32>
    %c0_7 = arith.constant 0 : index
    %c0_8 = arith.constant 0 : index
    %5 = vector.load %arg6[%c0_7, %c0_8] : memref<1x32xf32, #tpu.memory_space<vmem>>, vector<1x32xf32>
    %cst = arith.constant dense<0.000000e+00> : vector<8xf32>
    %6 = vector.multi_reduction <add>, %1, %cst [1] : vector<8x32xf32> to vector<8xf32>
    %7 = vector.shape_cast %6 : vector<8xf32> to vector<8x1xf32>
    %cst_9 = arith.constant 3.200000e+01 : f32
    %8 = vector.broadcast %cst_9 : f32 to vector<8x1xf32>
    %9 = arith.divf %7, %8 : vector<8x1xf32>
    %10 = vector.broadcast %9 : vector<8x1xf32> to vector<8x32xf32>
    %11 = arith.subf %1, %10 : vector<8x32xf32>
    %12 = arith.mulf %11, %11 : vector<8x32xf32>
    %cst_10 = arith.constant dense<0.000000e+00> : vector<8xf32>
    %13 = vector.multi_reduction <add>, %12, %cst_10 [1] : vector<8x32xf32> to vector<8xf32>
    %14 = vector.shape_cast %13 : vector<8xf32> to vector<8x1xf32>
    %cst_11 = arith.constant 3.200000e+01 : f32
    %15 = vector.broadcast %cst_11 : f32 to vector<8x1xf32>
    %16 = arith.divf %14, %15 : vector<8x1xf32>
    %17 = vector.broadcast %9 : vector<8x1xf32> to vector<8x32xf32>
    %18 = arith.subf %1, %17 : vector<8x32xf32>
    %cst_12 = arith.constant 9.99999974E-6 : f32
    %19 = vector.broadcast %cst_12 : f32 to vector<8x1xf32>
    %20 = arith.addf %16, %19 : vector<8x1xf32>
    %21 = math.rsqrt %20 : vector<8x1xf32>
    %22 = vector.broadcast %21 : vector<8x1xf32> to vector<8x32xf32>
    %23 = arith.mulf %18, %22 : vector<8x32xf32>
    %24 = vector.broadcast %4 : vector<1x32xf32> to vector<8x32xf32>
    %25 = arith.mulf %23, %24 : vector<8x32xf32>
    %26 = vector.broadcast %5 : vector<1x32xf32> to vector<8x32xf32>
    %27 = arith.addf %25, %26 : vector<8x32xf32>
    %28 = arith.truncf %27 : vector<8x32xf32> to vector<8x32xbf16>
    %c0_13 = arith.constant 0 : index
    %c0_14 = arith.constant 0 : index
    %29 = vector.load %arg5[%c0_13, %c0_14] : memref<1x32xf32, #tpu.memory_space<vmem>>, vector<1x32xf32>
    %c0_15 = arith.constant 0 : index
    %c0_16 = arith.constant 0 : index
    %30 = vector.load %arg6[%c0_15, %c0_16] : memref<1x32xf32, #tpu.memory_space<vmem>>, vector<1x32xf32>
    %cst_17 = arith.constant dense<0.000000e+00> : vector<8xf32>
    %31 = vector.multi_reduction <add>, %3, %cst_17 [1] : vector<8x32xf32> to vector<8xf32>
    %32 = vector.shape_cast %31 : vector<8xf32> to vector<8x1xf32>
    %cst_18 = arith.constant 3.200000e+01 : f32
    %33 = vector.broadcast %cst_18 : f32 to vector<8x1xf32>
    %34 = arith.divf %32, %33 : vector<8x1xf32>
    %35 = vector.broadcast %34 : vector<8x1xf32> to vector<8x32xf32>
    %36 = arith.subf %3, %35 : vector<8x32xf32>
    %37 = arith.mulf %36, %36 : vector<8x32xf32>
    %cst_19 = arith.constant dense<0.000000e+00> : vector<8xf32>
    %38 = vector.multi_reduction <add>, %37, %cst_19 [1] : vector<8x32xf32> to vector<8xf32>
    %39 = vector.shape_cast %38 : vector<8xf32> to vector<8x1xf32>
    %cst_20 = arith.constant 3.200000e+01 : f32
    %40 = vector.broadcast %cst_20 : f32 to vector<8x1xf32>
    %41 = arith.divf %39, %40 : vector<8x1xf32>
    %42 = vector.broadcast %34 : vector<8x1xf32> to vector<8x32xf32>
    %43 = arith.subf %3, %42 : vector<8x32xf32>
    %cst_21 = arith.constant 9.99999974E-6 : f32
    %44 = vector.broadcast %cst_21 : f32 to vector<8x1xf32>
    %45 = arith.addf %41, %44 : vector<8x1xf32>
    %46 = math.rsqrt %45 : vector<8x1xf32>
    %47 = vector.broadcast %46 : vector<8x1xf32> to vector<8x32xf32>
    %48 = arith.mulf %43, %47 : vector<8x32xf32>
    %49 = vector.broadcast %29 : vector<1x32xf32> to vector<8x32xf32>
    %50 = arith.mulf %48, %49 : vector<8x32xf32>
    %51 = vector.broadcast %30 : vector<1x32xf32> to vector<8x32xf32>
    %52 = arith.addf %50, %51 : vector<8x32xf32>
    %53 = arith.truncf %52 : vector<8x32xf32> to vector<8x32xbf16>
    %c0_22 = arith.constant 0 : index
    %c0_23 = arith.constant 0 : index
    %54 = vector.load %arg7[%c0_22, %c0_23] : memref<32x32xbf16, #tpu.memory_space<vmem>>, vector<32x32xbf16>
    %cst_24 = arith.constant dense<0.000000e+00> : vector<8x32xf32>
    %55 = tpu.matmul %28, %54, %cst_24 {dimension_numbers = #tpu.dot_dimension_numbers<[1], [0], [0], [1], [0, 0, 1, 1], [], []>} : vector<8x32xbf16>, vector<32x32xbf16>, vector<8x32xf32> -> vector<8x32xf32>
    %c0_25 = arith.constant 0 : index
    %c0_26 = arith.constant 0 : index
    %56 = vector.load %arg8[%c0_25, %c0_26] : memref<1x32xf32, #tpu.memory_space<vmem>>, vector<1x32xf32>
    %57 = vector.broadcast %56 : vector<1x32xf32> to vector<8x32xf32>
    %58 = arith.addf %55, %57 : vector<8x32xf32>
    %c0_27 = arith.constant 0 : index
    %c0_28 = arith.constant 0 : index
    %59 = vector.load %arg9[%c0_27, %c0_28] : memref<32x64xbf16, #tpu.memory_space<vmem>>, vector<32x64xbf16>
    %cst_29 = arith.constant dense<0.000000e+00> : vector<8x64xf32>
    %60 = tpu.matmul %53, %59, %cst_29 {dimension_numbers = #tpu.dot_dimension_numbers<[1], [0], [0], [1], [0, 0, 1, 1], [], []>} : vector<8x32xbf16>, vector<32x64xbf16>, vector<8x64xf32> -> vector<8x64xf32>
    %c0_30 = arith.constant 0 : index
    %c0_31 = arith.constant 0 : index
    %61 = vector.load %arg10[%c0_30, %c0_31] : memref<1x64xf32, #tpu.memory_space<vmem>>, vector<1x64xf32>
    %62 = vector.broadcast %61 : vector<1x64xf32> to vector<8x64xf32>
    %63 = arith.addf %60, %62 : vector<8x64xf32>
    %64 = vector.extract_strided_slice %63 {offsets = [0, 0], sizes = [8, 32], strides = [1, 1]} : vector<8x64xf32> to vector<8x32xf32>
    %65 = vector.extract_strided_slice %63 {offsets = [0, 32], sizes = [8, 32], strides = [1, 1]} : vector<8x64xf32> to vector<8x32xf32>
    %66 = vector.shape_cast %58 : vector<8x32xf32> to vector<8x4x8xf32>
    %67 = tpu.transpose %66, [1, 0, 2] : vector<8x4x8xf32> -> vector<4x8x8xf32>
    %68 = arith.truncf %67 : vector<4x8x8xf32> to vector<4x8x8xbf16>
    %69 = vector.shape_cast %64 : vector<8x32xf32> to vector<8x4x8xf32>
    %70 = tpu.transpose %69, [1, 0, 2] : vector<8x4x8xf32> -> vector<4x8x8xf32>
    %71 = arith.truncf %70 : vector<4x8x8xf32> to vector<4x8x8xbf16>
    %72 = vector.shape_cast %65 : vector<8x32xf32> to vector<8x4x8xf32>
    %73 = tpu.transpose %72, [1, 0, 2] : vector<8x4x8xf32> -> vector<4x8x8xf32>
    %74 = arith.truncf %73 : vector<4x8x8xf32> to vector<4x8x8xbf16>
    "tpu.trace_start"() <{level = 10 : i32, message = "hqd,hkd->hqk"}> : () -> ()
    %cst_32 = arith.constant dense<0.000000e+00> : vector<4x8x8xf32>
    %75 = tpu.matmul %68, %71, %cst_32 {dimension_numbers = #tpu.dot_dimension_numbers<[2], [2], [1], [1], [0, 0, 0, 1, 1, 1], [0], [0]>} : vector<4x8x8xbf16>, vector<4x8x8xbf16>, vector<4x8x8xf32> -> vector<4x8x8xf32>
    "tpu.trace_stop"() : () -> ()
    %c0_33 = arith.constant 0 : index
    %c0_34 = arith.constant 0 : index
    %76 = vector.load %arg4[%c0_33, %c0_34] : memref<8x8xf32, #tpu.memory_space<vmem>>, vector<8x8xf32>
    %77 = vector.shape_cast %76 : vector<8x8xf32> to vector<1x8x8xf32>
    %78 = vector.broadcast %77 : vector<1x8x8xf32> to vector<4x8x8xf32>
    %79 = arith.addf %75, %78 : vector<4x8x8xf32>
    %cst_35 = arith.constant dense<0xFF800000> : vector<4x8xf32>
    %80 = vector.multi_reduction <maximumf>, %79, %cst_35 [2] : vector<4x8x8xf32> to vector<4x8xf32>
    %81 = vector.shape_cast %80 : vector<4x8xf32> to vector<4x8x1xf32>
    %82 = vector.broadcast %81 : vector<4x8x1xf32> to vector<4x8x8xf32>
    %83 = arith.subf %79, %82 : vector<4x8x8xf32>
    %84 = math.exp %83 : vector<4x8x8xf32>
    %cst_36 = arith.constant dense<0.000000e+00> : vector<4x8xf32>
    %85 = vector.multi_reduction <add>, %84, %cst_36 [2] : vector<4x8x8xf32> to vector<4x8xf32>
    %86 = vector.shape_cast %85 : vector<4x8xf32> to vector<4x8x1xf32>
    %87 = tpu.reciprocal %86 {approx = true} : vector<4x8x1xf32> -> vector<4x8x1xf32>
    %88 = vector.broadcast %87 : vector<4x8x1xf32> to vector<4x8x8xf32>
    %89 = arith.mulf %84, %88 : vector<4x8x8xf32>
    %90 = arith.truncf %89 : vector<4x8x8xf32> to vector<4x8x8xbf16>
    "tpu.trace_start"() <{level = 10 : i32, message = "hqk,hkd->hqd"}> : () -> ()
    %cst_37 = arith.constant dense<0.000000e+00> : vector<4x8x8xf32>
    %91 = tpu.matmul %90, %74, %cst_37 {dimension_numbers = #tpu.dot_dimension_numbers<[2], [1], [1], [2], [0, 0, 0, 1, 1, 2], [0], [0]>} : vector<4x8x8xbf16>, vector<4x8x8xbf16>, vector<4x8x8xf32> -> vector<4x8x8xf32>
    "tpu.trace_stop"() : () -> ()
    %92 = tpu.transpose %91, [1, 0, 2] : vector<4x8x8xf32> -> vector<8x4x8xf32>
    %93 = vector.shape_cast %92 : vector<8x4x8xf32> to vector<8x32xf32>
    %94 = arith.truncf %93 : vector<8x32xf32> to vector<8x32xbf16>
    %c0_38 = arith.constant 0 : index
    %c0_39 = arith.constant 0 : index
    %95 = vector.load %arg11[%c0_38, %c0_39] : memref<32x32xbf16, #tpu.memory_space<vmem>>, vector<32x32xbf16>
    %cst_40 = arith.constant dense<0.000000e+00> : vector<8x32xf32>
    %96 = tpu.matmul %94, %95, %cst_40 {dimension_numbers = #tpu.dot_dimension_numbers<[1], [0], [0], [1], [0, 0, 1, 1], [], []>} : vector<8x32xbf16>, vector<32x32xbf16>, vector<8x32xf32> -> vector<8x32xf32>
    %c0_41 = arith.constant 0 : index
    %c0_42 = arith.constant 0 : index
    %97 = vector.load %arg12[%c0_41, %c0_42] : memref<1x32xf32, #tpu.memory_space<vmem>>, vector<1x32xf32>
    %98 = vector.broadcast %97 : vector<1x32xf32> to vector<8x32xf32>
    %99 = arith.addf %96, %98 : vector<8x32xf32>
    %100 = arith.addf %1, %99 : vector<8x32xf32>
    %c0_43 = arith.constant 0 : index
    %c0_44 = arith.constant 0 : index
    %101 = vector.load %arg13[%c0_43, %c0_44] : memref<1x32xf32, #tpu.memory_space<vmem>>, vector<1x32xf32>
    %c0_45 = arith.constant 0 : index
    %c0_46 = arith.constant 0 : index
    %102 = vector.load %arg14[%c0_45, %c0_46] : memref<1x32xf32, #tpu.memory_space<vmem>>, vector<1x32xf32>
    %cst_47 = arith.constant dense<0.000000e+00> : vector<8xf32>
    %103 = vector.multi_reduction <add>, %100, %cst_47 [1] : vector<8x32xf32> to vector<8xf32>
    %104 = vector.shape_cast %103 : vector<8xf32> to vector<8x1xf32>
    %cst_48 = arith.constant 3.200000e+01 : f32
    %105 = vector.broadcast %cst_48 : f32 to vector<8x1xf32>
    %106 = arith.divf %104, %105 : vector<8x1xf32>
    %107 = vector.broadcast %106 : vector<8x1xf32> to vector<8x32xf32>
    %108 = arith.subf %100, %107 : vector<8x32xf32>
    %109 = arith.mulf %108, %108 : vector<8x32xf32>
    %cst_49 = arith.constant dense<0.000000e+00> : vector<8xf32>
    %110 = vector.multi_reduction <add>, %109, %cst_49 [1] : vector<8x32xf32> to vector<8xf32>
    %111 = vector.shape_cast %110 : vector<8xf32> to vector<8x1xf32>
    %cst_50 = arith.constant 3.200000e+01 : f32
    %112 = vector.broadcast %cst_50 : f32 to vector<8x1xf32>
    %113 = arith.divf %111, %112 : vector<8x1xf32>
    %114 = vector.broadcast %106 : vector<8x1xf32> to vector<8x32xf32>
    %115 = arith.subf %100, %114 : vector<8x32xf32>
    %cst_51 = arith.constant 9.99999974E-6 : f32
    %116 = vector.broadcast %cst_51 : f32 to vector<8x1xf32>
    %117 = arith.addf %113, %116 : vector<8x1xf32>
    %118 = math.rsqrt %117 : vector<8x1xf32>
    %119 = vector.broadcast %118 : vector<8x1xf32> to vector<8x32xf32>
    %120 = arith.mulf %115, %119 : vector<8x32xf32>
    %121 = vector.broadcast %101 : vector<1x32xf32> to vector<8x32xf32>
    %122 = arith.mulf %120, %121 : vector<8x32xf32>
    %123 = vector.broadcast %102 : vector<1x32xf32> to vector<8x32xf32>
    %124 = arith.addf %122, %123 : vector<8x32xf32>
    %125 = arith.truncf %124 : vector<8x32xf32> to vector<8x32xbf16>
    %c0_52 = arith.constant 0 : index
    %c0_53 = arith.constant 0 : index
    %126 = vector.load %arg15[%c0_52, %c0_53] : memref<32x128xbf16, #tpu.memory_space<vmem>>, vector<32x128xbf16>
    %cst_54 = arith.constant dense<0.000000e+00> : vector<8x128xf32>
    %127 = tpu.matmul %125, %126, %cst_54 {dimension_numbers = #tpu.dot_dimension_numbers<[1], [0], [0], [1], [0, 0, 1, 1], [], []>} : vector<8x32xbf16>, vector<32x128xbf16>, vector<8x128xf32> -> vector<8x128xf32>
    %c0_55 = arith.constant 0 : index
    %c0_56 = arith.constant 0 : index
    %128 = vector.load %arg16[%c0_55, %c0_56] : memref<1x128xf32, #tpu.memory_space<vmem>>, vector<1x128xf32>
    %129 = vector.broadcast %128 : vector<1x128xf32> to vector<8x128xf32>
    %130 = arith.addf %127, %129 : vector<8x128xf32>
    %cst_57 = arith.constant 5.000000e-01 : f32
    %131 = vector.broadcast %cst_57 : f32 to vector<8x128xf32>
    %132 = arith.mulf %131, %130 : vector<8x128xf32>
    %cst_58 = arith.constant 0.707106769 : f32
    %133 = vector.broadcast %cst_58 : f32 to vector<8x128xf32>
    %134 = arith.mulf %130, %133 : vector<8x128xf32>
    %135 = math.erf %134 : vector<8x128xf32>
    %cst_59 = arith.constant 1.000000e+00 : f32
    %136 = vector.broadcast %cst_59 : f32 to vector<8x128xf32>
    %137 = arith.addf %136, %135 : vector<8x128xf32>
    %138 = arith.mulf %132, %137 : vector<8x128xf32>
    %139 = arith.truncf %138 : vector<8x128xf32> to vector<8x128xbf16>
    %c0_60 = arith.constant 0 : index
    %c0_61 = arith.constant 0 : index
    %140 = vector.load %arg17[%c0_60, %c0_61] : memref<128x32xbf16, #tpu.memory_space<vmem>>, vector<128x32xbf16>
    %cst_62 = arith.constant dense<0.000000e+00> : vector<8x32xf32>
    %141 = tpu.matmul %139, %140, %cst_62 {dimension_numbers = #tpu.dot_dimension_numbers<[1], [0], [0], [1], [0, 0, 1, 1], [], []>} : vector<8x128xbf16>, vector<128x32xbf16>, vector<8x32xf32> -> vector<8x32xf32>
    %c0_63 = arith.constant 0 : index
    %c0_64 = arith.constant 0 : index
    %142 = vector.load %arg18[%c0_63, %c0_64] : memref<1x32xf32, #tpu.memory_space<vmem>>, vector<1x32xf32>
    %143 = vector.broadcast %142 : vector<1x32xf32> to vector<8x32xf32>
    %144 = arith.addf %141, %143 : vector<8x32xf32>
    %145 = arith.addf %100, %144 : vector<8x32xf32>
    %c0_65 = arith.constant 0 : index
    %c0_66 = arith.constant 0 : index
    %c0_67 = arith.constant 0 : index
    %146 = vector.load %arg19[%c0_65, %c0_66, %c0_67] : memref<1x8x32xf32, #tpu.memory_space<vmem>>, vector<1x8x32xf32>
    %147 = vector.shape_cast %146 : vector<1x8x32xf32> to vector<8x32xf32>
    %148 = vector.shape_cast %145 : vector<8x32xf32> to vector<1x8x32xf32>
    tpu.vector_store %arg19[%c0_65, %c0_66, %c0_67], %148 {strides = array<i32>} : memref<1x8x32xf32, #tpu.memory_space<vmem>>, vector<1x8x32xf32>,
    return
  }
  func.func @transform_0(%arg0: i32, %arg1: i32) -> (i32, i32, i32) {
    %c0_i32 = arith.constant 0 : i32
    %c0_i32_0 = arith.constant 0 : i32
    return %arg0, %arg1, %c0_i32 : i32, i32, i32
  }
  func.func @transform_1(%arg0: i32, %arg1: i32) -> (i32, i32, i32) {
    %c0_i32 = arith.constant 0 : i32
    %c0_i32_0 = arith.constant 0 : i32
    %c0_i32_1 = arith.constant 0 : i32
    return %arg0, %c0_i32, %c0_i32_0 : i32, i32, i32
  }
  func.func @transform_2(%arg0: i32, %arg1: i32) -> (i32, i32) {
    %c0_i32 = arith.constant 0 : i32
    %c0_i32_0 = arith.constant 0 : i32
    return %arg1, %c0_i32 : i32, i32
  }
  func.func @transform_3(%arg0: i32, %arg1: i32) -> (i32, i32) {
    %c0_i32 = arith.constant 0 : i32
    %c0_i32_0 = arith.constant 0 : i32
    %c0_i32_1 = arith.constant 0 : i32
    return %c0_i32, %c0_i32_0 : i32, i32
  }
  func.func @transform_4(%arg0: i32, %arg1: i32) -> (i32, i32) {
    %c0_i32 = arith.constant 0 : i32
    %c0_i32_0 = arith.constant 0 : i32
    %c0_i32_1 = arith.constant 0 : i32
    return %c0_i32, %c0_i32_0 : i32, i32
  }
  func.func @transform_5(%arg0: i32, %arg1: i32) -> (i32, i32) {
    %c0_i32 = arith.constant 0 : i32
    %c0_i32_0 = arith.constant 0 : i32
    %c0_i32_1 = arith.constant 0 : i32
    return %c0_i32, %c0_i32_0 : i32, i32
  }
  func.func @transform_6(%arg0: i32, %arg1: i32) -> (i32, i32) {
    %c0_i32 = arith.constant 0 : i32
    %c0_i32_0 = arith.constant 0 : i32
    %c0_i32_1 = arith.constant 0 : i32
    return %c0_i32, %c0_i32_0 : i32, i32
  }
  func.func @transform_7(%arg0: i32, %arg1: i32) -> (i32, i32) {
    %c0_i32 = arith.constant 0 : i32
    %c0_i32_0 = arith.constant 0 : i32
    %c0_i32_1 = arith.constant 0 : i32
    return %c0_i32, %c0_i32_0 : i32, i32
  }
  func.func @transform_8(%arg0: i32, %arg1: i32) -> (i32, i32) {
    %c0_i32 = arith.constant 0 : i32
    %c0_i32_0 = arith.constant 0 : i32
    %c0_i32_1 = arith.constant 0 : i32
    return %c0_i32, %c0_i32_0 : i32, i32
  }
  func.func @transform_9(%arg0: i32, %arg1: i32) -> (i32, i32) {
    %c0_i32 = arith.constant 0 : i32
    %c0_i32_0 = arith.constant 0 : i32
    %c0_i32_1 = arith.constant 0 : i32
    return %c0_i32, %c0_i32_0 : i32, i32
  }
  func.func @transform_10(%arg0: i32, %arg1: i32) -> (i32, i32) {
    %c0_i32 = arith.constant 0 : i32
    %c0_i32_0 = arith.constant 0 : i32
    %c0_i32_1 = arith.constant 0 : i32
    return %c0_i32, %c0_i32_0 : i32, i32
  }
  func.func @transform_11(%arg0: i32, %arg1: i32) -> (i32, i32) {
    %c0_i32 = arith.constant 0 : i32
    %c0_i32_0 = arith.constant 0 : i32
    %c0_i32_1 = arith.constant 0 : i32
    return %c0_i32, %c0_i32_0 : i32, i32
  }
  func.func @transform_12(%arg0: i32, %arg1: i32) -> (i32, i32) {
    %c0_i32 = arith.constant 0 : i32
    %c0_i32_0 = arith.constant 0 : i32
    %c0_i32_1 = arith.constant 0 : i32
    return %c0_i32, %c0_i32_0 : i32, i32
  }
  func.func @transform_13(%arg0: i32, %arg1: i32) -> (i32, i32) {
    %c0_i32 = arith.constant 0 : i32
    %c0_i32_0 = arith.constant 0 : i32
    %c0_i32_1 = arith.constant 0 : i32
    return %c0_i32, %c0_i32_0 : i32, i32
  }
  func.func @transform_14(%arg0: i32, %arg1: i32) -> (i32, i32) {
    %c0_i32 = arith.constant 0 : i32
    %c0_i32_0 = arith.constant 0 : i32
    %c0_i32_1 = arith.constant 0 : i32
    return %c0_i32, %c0_i32_0 : i32, i32
  }
  func.func @transform_15(%arg0: i32, %arg1: i32) -> (i32, i32) {
    %c0_i32 = arith.constant 0 : i32
    %c0_i32_0 = arith.constant 0 : i32
    %c0_i32_1 = arith.constant 0 : i32
    return %c0_i32, %c0_i32_0 : i32, i32
  }
  func.func @transform_16(%arg0: i32, %arg1: i32) -> (i32, i32) {
    %c0_i32 = arith.constant 0 : i32
    %c0_i32_0 = arith.constant 0 : i32
    %c0_i32_1 = arith.constant 0 : i32
    return %c0_i32, %c0_i32_0 : i32, i32
  }
  func.func @transform_17(%arg0: i32, %arg1: i32) -> (i32, i32, i32) {
    %c0_i32 = arith.constant 0 : i32
    %c0_i32_0 = arith.constant 0 : i32
    return %arg0, %arg1, %c0_i32 : i32, i32, i32
  }
}

</mosaic_0001>

<bundles_post_ra>
// kernel: tpu_custom_call.1
= control target key start
LH: loop header
LB: loop body
LE: loop exit
PB: predicated region body
PF: predicated region fallthrough
CT: control target
= control target key end

     0   :  { %s3346_s0 = inlined_call_operand.vmem [shape: f32[2,8,32], index: 0, kind: input, shape index: {}]   ;;  %s3347_s1 = inlined_call_operand.vmem [shape: f32[2,8,32], index: 1, kind: input, shape index: {}]   ;;  %s3348_s2 = inlined_call_operand.hbm [shape: f32[8,8], index: 2, kind: input, shape index: {}]   ;;  %s3349_s3 = inlined_call_operand.vmem [shape: f32[1,32], index: 3, kind: input, shape index: {}]   ;;  %s3350_s4 = inlined_call_operand.vmem [shape: f32[1,32], index: 4, kind: input, shape index: {}]   ;;  %s3351_s5 = inlined_call_operand.vmem [shape: bf16[32,32], index: 5, kind: input, shape index: {}]   ;;  %s3352_s6 = inlined_call_operand.hbm [shape: f32[1,32], index: 6, kind: input, shape index: {}]   ;;  %s3353_s7 = inlined_call_operand.vmem [shape: bf16[32,64], index: 7, kind: input, shape index: {}]   ;;  %s3354_s8 = inlined_call_operand.hbm [shape: f32[1,64], index: 8, kind: input, shape index: {}]   ;;  %s3355_s9 = inlined_call_operand.vmem [shape: bf16[32,32], index: 9, kind: input, shape index: {}]   ;;  %s3356_s10 = inlined_call_operand.vmem [shape: f32[1,32], index: 10, kind: input, shape index: {}]   ;;  %s3357_s11 = inlined_call_operand.vmem [shape: f32[1,32], index: 11, kind: input, shape index: {}]   ;;  %s3358_s12 = inlined_call_operand.vmem [shape: f32[1,32], index: 12, kind: input, shape index: {}]   ;;  %s3359_s13 = inlined_call_operand.vmem [shape: bf16[32,128], index: 13, kind: input, shape index: {}]   ;;  %s3360_s14 = inlined_call_operand.vmem [shape: f32[1,128], index: 14, kind: input, shape index: {}]   ;;  %s3361_s15 = inlined_call_operand.vmem [shape: bf16[128,32], index: 15, kind: input, shape index: {}]   ;;  %s3362_s16 = inlined_call_operand.vmem [shape: f32[1,32], index: 16, kind: input, shape index: {}]   ;;  %s3363_s17 = inlined_call_operand.hbm [shape: f32[2,8,32], index: 17, kind: output, shape index: {}]  }
   0x1   :  { %3378 = sst [smem:[#allocation20_spill]] %s3346_s0 }
   0x2   :  { %3379 = sst [smem:[#allocation21_spill]] %s3347_s1 }
   0x3   :  { %3380 = sst [smem:[#allocation22_spill]] %s3352_s6 }
   0x4   :  { %3381 = sst [smem:[#allocation23_spill]] %s3362_s16 }
   0x5   :  { %3382 = sst [smem:[#allocation24_spill]] %s3363_s17 }
   0x6   :  { %22 = vsyncpa [#allocation3], 0 }
   0x7   :  { %23 = vsyncpa [#allocation6], 0 }
   0x8   :  { %24 = vsyncpa [#allocation4], 0 }
   0x9   :  { %26 = vsyncpa [#allocation4 + $0x1], 0  ;;  %s2866_s24 = smov 0   ;;  %s2868_s25 = smov 0  }
   0xa   :  { %s2870_s26 = smov 0   ;;  %s2872_s27 = smov 0  }
   0xb   :  { %s2874_s28 = smov 0   ;;  %s2876_s29 = smov 0  }
   0xc LB: > { %3383 = sst [smem:[#allocation12_spill]] %s2739_s24  ;;  %s2252_s0 = sadd.s32 4294967295, %s2759_s29   ;;  %s2759_s29 = sphi %s2876_s29, %s32_s29   ;;  %s2755_s28 = sphi %s2874_s28, %s3413_s28   ;;  %s2751_s27 = sphi %s2872_s27, %s3412_s27   ;;  %s2747_s26 = sphi %s2870_s26, %s3411_s26   ;;  %s2743_s25 = sphi %s2868_s25, %s3415_s25   ;;  %s2739_s24 = sphi %s2866_s24, %s3414_s24  }
   0xd   : > { %3384 = sst [smem:[#allocation13_spill]] %s2747_s26  ;;  %s2253_s30 = sadd.s32 4294967294, %s2759_s29  }
   0xe   : > { %3385 = sst [smem:[#allocation14_spill]] %s2755_s28  ;;  %s44_s18 = sadd.s32 1, %s2755_s28 }
   0xf   : > { %3386 = sst [smem:[#allocation15_spill]] %s2759_s29  ;;  %s427_s19 = sadd.s32 1, %s2747_s26 }
  0x10   : > { %p46_p0 = scmp.ge.s32.totalorder %s44_s18, 2  ;;  %p437_p1 = scmp.ne.s32.totalorder %s2747_s26, %s2743_s25 }
  0x11   : > { %p438_p2 = scmp.eq.s32.totalorder %s2252_s0, 1  ;;  %p443_p3 = scmp.ne.s32.totalorder %s2743_s25, %s2739_s24 }
  0x12   : > { %s3417_s18 = smov (%p46_p0, %s44_s18), 0  ;;  %p444_p5 = scmp.eq.s32.totalorder %s2253_s30, 1 }
  0x13   : > { %3387 = sst [smem:[#allocation16_spill]] %s3417_s18  ;;  %p2906_p4 = por %p438_p2, %p437_p1 }
  0x14   : > { %s422_s20 = ssub.s32 %s2755_s28, %s3417_s18  ;;  %p2254_p6 = scmp.ge.s32.totalorder %s2759_s29, 1 }
  0x15   : > { %s3388_s1 = scalar_select %p2906_p4, 1, 0 }
  0x16   : > { %p425_p7 = scmp.eq.s32.totalorder %s422_s20, 0  ;;  %p2913_p8 = por %p444_p5, %p443_p3 }
  0x17   : > { %3389 = sst [smem:[#allocation17_spill]] %s3388_s1  ;;  %p451_p9 = scmp.lt.s32.totalorder %s2759_s29, 3 }
  0x18   : > { %s3390_s21 = scalar_select %p2913_p8, 1, 0 }
  0x19   : > { %s2919_s22 = scalar_select %p425_p7, %s2747_s26, %s427_s19  }
  0x1a   : > { %3391 = sst [smem:[#allocation18_spill]] %s3390_s21  ;;  %p2921_p10 = pnand %p2254_p6, %p451_p9 }
  0x1b   : > { %3392 = sst [smem:[#allocation19_spill]] %s2919_s22  ;;  %p2925_p11 = scmp.eq.s32.totalorder %s2252_s0, 0 }
  0x1c   : > { %s3393_s23 = scalar_select %p2921_p10, 1, 0 }
  0x1d   : > { %s3394_s24 = scalar_select %p2925_p11, 1, 0 }
  0x1e   : > { %p2466_p12 = pneg %p2921_p10  ;;  %s2761_s30 = smov [#allocation5]  }
  0x1f   : > { %s486_s20 = sshll.u32 %s2761_s30, 4  ;;  %s2762_s19 = smov [#allocation2]   ;;  %s487_s20 = int_to_ptr.vmem [resolvable:$true] %s486_s20 }
  0x20   : > { %p2933_p13 = pnand %p2925_p11, %p2466_p12  ;;  %s466_s28 = sshll.u32 %s2762_s19, 4  ;;  %s2937_s28 = int_to_ptr.vmem [resolvable:$true] %s466_s28 }
  0x21   : > { %s3396_s6 = sld [smem:[#allocation22_spill]] }
  0x22   : > { %p2947_p1 = pneg %p2933_p13 }
  0x27   : > { %s2589_s26 = scalar_lea.hbm %s3396_s6, 16 }
  0x28   : > { %p2590_p0 = scmp.ne.s32.totalorder %s3396_s6, %s2589_s26  ;;  %p2596_p5 = scmp.lt.u32.totalorder %s2589_s26, %s3396_s6 }
  0x2a   : > { %p2592_p2 = pnand %p2947_p1, %p2590_p0 }
  0x2c   : > { %p2593_p3 = pneg %p2592_p2 }
  0x2e   : > { %p2598_p6 = pnand %p2596_p5, %p2593_p3 }
  0x30   : > { %2601 = shalt.err (!%p2598_p6)
}
  0x31   : > { %s2602_s22 = scalar_lea.vmem %s487_s20, 16  ;;  %s2609_s29 = scalar_lea.vmem %s487_s20, 32 }
  0x32   : > { %p2603_p7 = scmp.ne.s32.totalorder %s487_s20, %s2602_s22  ;;  %p2610_p8 = scmp.lt.s32.totalorder %s487_s20, %s487_s20 }
  0x33   : > { %p2611_p4 = scmp.lt.s32.totalorder %s2609_s29, %s2602_s22 }
  0x34   : > { %p2605_p9 = pnand %p2603_p7, %p2947_p1 }
  0x35   : > { %p2612_p11 = por %p2611_p4, %p2610_p8 }
  0x36   : > { %p2606_p12 = pneg %p2605_p9 }
  0x38   : > { %p2613_p10 = pnand %p2612_p11, %p2606_p12 }
  0x3a   : > { %2616 = shalt.err (!%p2613_p10)
}
  0x3b   : > { %2472 = dma.hbm_to_vmem [thread:$0]  (!%p2933_p13), %s3396_s6, 16, %s487_s20, [#allocation6]  }
  0x3c   : > { %s2617_s19 = scalar_lea.hbm %s3348_s2, 128 }
  0x3d   : > { %p2618_p0 = scmp.ne.s32.totalorder %s3348_s2, %s2617_s19  ;;  %p2624_p8 = scmp.lt.u32.totalorder %s2617_s19, %s3348_s2 }
  0x3f   : > { %p2620_p2 = pnand %p2618_p0, %p2947_p1 }
  0x41   : > { %p2621_p4 = pneg %p2620_p2 }
  0x43   : > { %p2626_p10 = pnand %p2624_p8, %p2621_p4 }
  0x45   : > { %2629 = shalt.err (!%p2626_p10)
}
  0x46   : > { %s2630_s20 = scalar_lea.vmem %s2937_s28, 128  ;;  %p2638_p6 = scmp.lt.s32.totalorder %s2937_s28, %s2937_s28 }
  0x47   : > { %p2631_p11 = scmp.ne.s32.totalorder %s2937_s28, %s2630_s20  ;;  %p2639_p7 = scmp.lt.s32.totalorder %s2630_s20, %s2630_s20 }
  0x49   : > { %p2633_p3 = pnand %p2631_p11, %p2947_p1  ;;  %p2640_p9 = por %p2639_p7, %p2638_p6 }
  0x4b   : > { %p2634_p5 = pneg %p2633_p3 }
  0x4d   : > { %p2641_p12 = pnand %p2640_p9, %p2634_p5 }
  0x4f   : > { %2644 = shalt.err (!%p2641_p12)
}
  0x50   : > { %2469 = dma.hbm_to_vmem [thread:$0]  (!%p2933_p13), %s3348_s2, 128, %s2937_s28, [#allocation3]  }
  0x51   : > { %s2763_s21 = smov [#allocation7]   ;;  %s2645_s19 = scalar_lea.hbm %s3354_s8, 16 }
  0x52   : > { %s500_s0 = sshll.u32 %s2763_s21, 4  ;;  %p2646_p0 = scmp.ne.s32.totalorder %s3354_s8, %s2645_s19  ;;  %s501_s0 = int_to_ptr.vmem [resolvable:$true] %s500_s0 }
  0x53   : > { %p2652_p8 = scmp.lt.u32.totalorder %s2645_s19, %s3354_s8 }
  0x54   : > { %p2648_p2 = pnand %p2646_p0, %p2947_p1 }
  0x56   : > { %p2649_p4 = pneg %p2648_p2 }
  0x58   : > { %p2654_p10 = pnand %p2652_p8, %p2649_p4 }
  0x5a   : > { %2657 = shalt.err (!%p2654_p10)
}
  0x5b   : > { %s2658_s28 = scalar_lea.vmem %s501_s0, 16  ;;  %s2665_s16 = scalar_lea.vmem %s501_s0, 32 }
  0x5c   : > { %p2659_p11 = scmp.ne.s32.totalorder %s501_s0, %s2658_s28  ;;  %p2666_p6 = scmp.lt.s32.totalorder %s501_s0, %s501_s0 }
  0x5d   : > { %p2667_p7 = scmp.lt.s32.totalorder %s2665_s16, %s2658_s28 }
  0x5e   : > { %p2661_p3 = pnand %p2659_p11, %p2947_p1 }
  0x5f   : > { %p2668_p9 = por %p2667_p7, %p2666_p6 }
  0x60   : > { %p2662_p5 = pneg %p2661_p3 }
  0x62   : > { %p2669_p12 = pnand %p2668_p9, %p2662_p5 }
  0x64   : > { %2672 = shalt.err (!%p2669_p12)
}
  0x65   : > { %2475 = dma.hbm_to_vmem [thread:$0]  (!%p2933_p13), %s3354_s8, 16, %s501_s0, [#allocation6]  }
  0x66   : > { %p3398_p0 = scmp.ne.s32.totalorder %s3393_s23, 0 }
  0x67   : > { %p3399_p2 = scmp.ne.s32.totalorder (!%p3398_p0), %s3394_s24, 0 }
  0x68   : > { %554 = sbr.rel (%p3398_p0) target bundleno = 2744 (0xab8), region = 88 }
  0x6f   : > { %2726 = dma.done.wait (%p3399_p2), [#allocation3], 128  }
  0x70   : > { %2728 = vsyncadd (%p3399_p2), [#allocation3], 4294967168 }
  0x71   : > { %2730 = dma.done.wait (%p3399_p2), [#allocation6], 32  }
  0x72   : > { %2732 = vsyncadd (%p3399_p2), [#allocation6], 4294967264  ;;  %p620_p1 = scmp.lt.s32.totalorder %s2751_s27, 1  ;;  %s3400_s0 = sld [smem:[#allocation20_spill]]  ;;  %vm636_vm0 = vcmask 261120   ;;  %v2549_v14 = vld [vmem:[%s3351_s5] sm:$0xff]   ;;  %v829_v51 = vlaneseq }
  0x73   : > { %s3401_s22 = sld [smem:[#allocation21_spill]]  ;;  %v2764_v15 = vmov 0.0   ;;  %v2550_v16 = vld [vmem:[%s3351_s5 + $0x8] sm:$0xff]   ;;  %vm2765_vm1 = vmmov 0   ;;  %v2266_v24 = vld [vmem:[%s3349_s3] ss:$0 sm:$0xff] }
  0x74   : > { %s621_s6 = scalar_select %p620_p1, %s2751_s27, 1  ;;  %2352 = vmatprep.subr.bf16.mxu1 %v2764_v15  ;;  %2380 = vmatprep.subr.bf16.mxu0 %v2764_v15  ;;  %v2267_v26 = vld [vmem:[%s3350_s4] ss:$0 sm:$0xff]  ;;  %v2552_v34 = vld [vmem:[%s3353_s7 + $0x8] sm:$0xff]   ;;  %v2769_v49 = vmov 1983009808  }
  0x75   : > { %2353 = vmatpush3.bf16.msra.mxu1 %v2549_v14  ;;  %2356 = vmatprep.mubr.msk.bf16.mxu1 %vm2765_vm1, %v2764_v15  ;;  %v2551_v31 = vld [vmem:[%s3353_s7] sm:$0xff]   ;;  %v2272_v41 = vld [vmem:[#allocation7] ss:$0 sm:$0xff]  ;;  %v2268_v45 = vld [vmem:[#allocation5] ss:$0 sm:$0xff]  ;;  %s2766_s26 = smov 112   ;;  %v827_v50 = vunpack.c.l.s4 %v2769_v49 }
  0x76   : > { %s2264_s18 = sshll.u32 %s621_s6, 3  ;;  %2354 = vmatprep.subr.bf16.mxu1 %v2764_v15  ;;  %2382 = vmatprep.mubr.msk.bf16.mxu0 %vm2765_vm1, %v2764_v15  ;;  %s2767_s19 = smov 120   ;;  %v2770_v52 = vmov 1934713408   ;;  %v830_v55 = vshrl.u32 %v829_v51, 7  ;;  %vm1267_vm2 = vcmask 64512  }
  0x77   : > { %v859_v53 = vunpack.c.l.s4 %v2770_v52  ;;  %v828_v54 = vunpack.c.0.s8 %v827_v50  ;;  %vm1503_vm3 = vcmask 1043456   ;;  %s2772_s1 = smov 16   ;;  %s2773_s21 = smov 8   ;;  %vm1834_vm4 = vcmask 130048  }
  0x78   : > { %s626_s17 = scalar_lea.vmem %s3400_s0, %s2264_s18  ;;  %s2774_s6 = smov 24   ;;  %vm1836_vm5 = vcmask 195584  }
  0x79   : > { %s630_s29 = scalar_lea.vmem %s3401_s22, %s2264_s18  ;;  %v3022_v0 = vld [vmem:[%s626_s17] sm:$0xff]  ;;  %2355 = vmatpush3.bf16.msra.mxu1 %v2550_v16  ;;  %s2768_s22 = smov 104   ;;  %v860_v57 = vunpack.c.0.s8 %v859_v53  ;;  %v3071_v58 = vsub.s32 %v828_v54, %v830_v55 }
  0x7a   : > { %v633_v1 = vld [vmem:[%s630_s29] sm:$0xff]  ;;  %v637_v2 = vsel %vm636_vm0, %v3022_v0, 0.0  ;;  %2360 = vmatprep.subr.bf16.mxu1 %v2764_v15  ;;  %s2771_s29 = smov 96   ;;  %s617_s16 = sand.u32 1, %s2743_s25  }
  0x7b   : > { %v666_v3 = vsel %vm636_vm0, %v633_v1, 0.0  ;;  %638 = vadd.xlane.f32.xlu0 %v637_v2  ;;  %v3085_v2 = vsub.s32 %v860_v57, %v830_v55  ;;  %s3402_s18 = sld [smem:[#allocation23_spill]]  ;;  %s2312_s23 = sshll.u32 %s2751_s27, 7 }
  0x7c   : > { %s3403_s30 = sld [smem:[#allocation17_spill]]  ;;  %s2122_s27 = scalar_lea.sflag [#allocation4], %s617_s16 }
  0x7d   : > { %s2775_s20 = smov [#allocation8]  }
  0x7e   : > { %s2677_s28 = sshll.u32 %s2775_s20, 4  ;;  %s2678_s28 = int_to_ptr.vmem [resolvable:$false] %s2677_s28 }
  0x7f   : > { %667 = vadd.xlane.f32.xlu0 %v666_v3 }
  0x82   : > { %p3405_p4 = scmp.ne.s32.totalorder %s3403_s30, 0 }
 0x108   : > { %v639_v4 = vpop.xlane.xlu0 %638 }
 0x109   : > { %v641_v5 = vmul.f32 0.03125, %v639_v4 }
 0x10b   : > { %v642_v6 = vsub.f32 %v3022_v0, %v641_v5 }
 0x10c   : > { %v668_v7 = vpop.xlane.xlu0 %667 }
 0x10d   : > { %v669_v8 = vmul.f32 0.03125, %v668_v7  ;;  %v643_v9 = vmul.f32 %v642_v6, %v642_v6 }
 0x10f   : > { %v670_v10 = vsub.f32 %v633_v1, %v669_v8  ;;  %v644_v11 = vsel %vm636_vm0, %v643_v9, 0.0 }
 0x110   : > { %645 = vadd.xlane.f32.xlu1 %v644_v11 }
 0x111   : > { %v671_v12 = vmul.f32 %v670_v10, %v670_v10 }
 0x113   : > { %v672_v13 = vsel %vm636_vm0, %v671_v12, 0.0 }
 0x114   : > { %673 = vadd.xlane.f32.xlu1 %v672_v13 }
 0x19d   : > { %v646_v17 = vpop.xlane.xlu1 %645 }
 0x19e   : > { %v647_v18 = vmul.f32 0.03125, %v646_v17 }
 0x1a0   : > { %v648_v19 = vadd.f32 1e-05, %v647_v18 }
 0x1a1   : > { %v674_v20 = vpop.xlane.xlu1 %673 }
 0x1a2   : > { %2565 = vrsqrt.f32 %v648_v19  ;;  %v675_v21 = vmul.f32 0.03125, %v674_v20 }
 0x1a4   : > { %v676_v22 = vadd.f32 1e-05, %v675_v21 }
 0x1a6   : > { %2567 = vrsqrt.f32 %v676_v22 }
 0x1ac   : > { %v2566_v23 = vpop.eup %2565 }
 0x1ad   : > { %v650_v25 = vmul.f32 %v2566_v23, %v642_v6 }
 0x1af   : > { %v657_v27 = vmul.f32 %v2266_v24, %v650_v25 }
 0x1b0   : > { %v2568_v28 = vpop.eup %2567 }
 0x1b1   : > { %v678_v29 = vmul.f32 %v2568_v28, %v670_v10  ;;  %v664_v30 = vadd.f32 %v2267_v26, %v657_v27 }
 0x1b3   : > { %v665_v32 = vpack.c.bf16 %v664_v30, %v664_v30  ;;  %v679_v33 = vmul.f32 %v2266_v24, %v678_v29 }
 0x1b5   : > { %2357 = vmatmul.mubr.msk.bf16.vlgmr.msra.gmra.mrb[0].mxu1 %vm636_vm0, %v665_v32  ;;  %v680_v35 = vadd.f32 %v2267_v26, %v679_v33 }
 0x1b6   : > { %2361 = vmatpush3.bf16.msra.mxu1 %v2551_v31  ;;  %2364 = vmatprep.mubr.msk.bf16.mxu1 %vm2765_vm1, %v2764_v15 }
 0x1b7   : > { %2362 = vmatprep.subr.bf16.mxu1 %v2764_v15  ;;  %v681_v36 = vpack.c.bf16 %v680_v35, %v680_v35 }
 0x1ba   : > { %2363 = vmatpush3.bf16.msra.mxu1 %v2552_v34 }
 0x1bb   : > { %2368 = vmatprep.subr.bf16.mxu1 %v2764_v15 }
 0x1bd   : > { %2365 = vmatmul.mubr.msk.bf16.vlgmr.msra.gmra.mrb[4].mxu1 %vm636_vm0, %v681_v36 }
 0x1be   : > { %2370 = vmatprep.mubr.msk.bf16.mxu1 %vm2765_vm1, %v2764_v15 }
 0x288   : > { %v742_v37 = vpop.f32.mrb[0].mxu1 }
 0x289   : > { %v2358_v38 = vpop.f32.mrb[1].mxu1  ;;  %v743_v48 = vadd.f32 %v2268_v45, %v742_v37 }
 0x28a   : > { %v745_v39 = vpop.f32.mrb[2].mxu1 }
 0x28b   : > { %v2359_v40 = vpop.f32.mrb[3].mxu1 }
 0x290   : > { %v808_v42 = vpop.f32.mrb[4].mxu1 }
 0x291   : > { %v3064_v43 = vadd.f32 %v2272_v41, %v808_v42  ;;  %v2366_v44 = vpop.f32.mrb[5].mxu1 }
 0x292   : > { %v811_v46 = vpop.f32.mrb[6].mxu1 }
 0x293   : > { %968 = vrot.lane.b32.xlu1 %v3064_v43, %s2766_s26  ;;  %965 = vrot.lane.b32.xlu0 %v3064_v43, %s2767_s19  ;;  %v2367_v47 = vpop.f32.mrb[7].mxu1 }
 0x297   : > { %971 = vrot.lane.b32.xlu1 %v3064_v43, %s2768_s22  ;;  %818 = vrot.lane.b32.xlu0 %v743_v48, %s2766_s26 }
 0x29b   : > { %815 = vrot.lane.b32.xlu1 %v743_v48, %s2767_s19 }
 0x29f   : > { %821 = vrot.lane.b32.xlu1 %v743_v48, %s2768_s22  ;;  %s3404_s22 = sld [smem:[#allocation24_spill]] }
 0x305   : > { %v3069_v56 = vpop.permute.xlu1 %968  ;;  %v3077_v61 = vpop.permute.xlu0 %965 }
 0x306   : > { %v974_v59 = vcombine.low %v3064_v43, %v3069_v56  ;;  %v975_v60 = vcombine.high %v3064_v43, %v3069_v56 }
 0x308   : > { %v982_v3 = vrot.slane %v974_v59, %v3071_v58  ;;  %v989_v4 = vrot.slane %v975_v60, %v3071_v58 }
 0x309   : > { %v3079_v62 = vpop.permute.xlu1 %971  ;;  %v819_v12 = vpop.permute.xlu0 %818 }
 0x30a   : > { %v990_v63 = vcombine.low %v3077_v61, %v3079_v62  ;;  %v991_v1 = vcombine.high %v3077_v61, %v3079_v62  ;;  %v824_v18 = vcombine.low %v743_v48, %v819_v12  ;;  %v825_v19 = vcombine.high %v743_v48, %v819_v12 }
 0x30c   : > { %v998_v5 = vrot.slane %v990_v63, %v3071_v58  ;;  %v1005_v6 = vrot.slane %v991_v1, %v3071_v58  ;;  %v832_v31 = vrot.slane %v824_v18, %v3071_v58  ;;  %v839_v32 = vrot.slane %v825_v19, %v3071_v58 }
 0x30d   : > { %v816_v7 = vpop.permute.xlu1 %815 }
 0x30e   : > { %v1006_v8 = vcombine.low %v982_v3, %v998_v5  ;;  %v1007_v9 = vcombine.high %v982_v3, %v998_v5  ;;  %v1022_v10 = vcombine.low %v989_v4, %v1005_v6  ;;  %v1023_v11 = vcombine.high %v989_v4, %v1005_v6 }
 0x310   : > { %v1014_v13 = vrot.slane %v1006_v8, %v3085_v2  ;;  %v1021_v14 = vrot.slane %v1007_v9, %v3085_v2  ;;  %v1030_v16 = vrot.slane %v1022_v10, %v3085_v2  ;;  %v1037_v17 = vrot.slane %v1023_v11, %v3085_v2 }
 0x311   : > { %v822_v20 = vpop.permute.xlu1 %821 }
 0x312   : > { %v1042_v21 = vcombine.low %v1014_v13, %v1021_v14  ;;  %v2278_v22 = vcombine.high %v1014_v13, %v1021_v14  ;;  %v1058_v23 = vcombine.low %v1030_v16, %v1037_v17  ;;  %v2279_v24 = vcombine.high %v1030_v16, %v1037_v17 }
 0x313   : > { %v840_v25 = vcombine.low %v816_v7, %v822_v20  ;;  %v841_v26 = vcombine.high %v816_v7, %v822_v20 }
 0x314   : > { %v1049_v27 = vrot.slane %v1042_v21, %v3071_v58  ;;  %v1057_v28 = vrot.slane %v2278_v22, %v3071_v58  ;;  %v1065_v29 = vrot.slane %v1058_v23, %v3071_v58  ;;  %v1073_v30 = vrot.slane %v2279_v24, %v3071_v58 }
 0x315   : > { %v848_v33 = vrot.slane %v840_v25, %v3071_v58  ;;  %v855_v34 = vrot.slane %v841_v26, %v3071_v58 }
 0x316   : > { %v1074_v35 = vcombine.low %v1049_v27, %v1057_v28  ;;  %v1090_v36 = vcombine.low %v1065_v29, %v1073_v30  ;;  %v1075_v37 = vcombine.high %v1049_v27, %v1057_v28  ;;  %v1091_v38 = vcombine.high %v1065_v29, %v1073_v30 }
 0x317   : > { %v856_v39 = vcombine.low %v832_v31, %v848_v33  ;;  %v857_v40 = vcombine.high %v832_v31, %v848_v33  ;;  %v872_v41 = vcombine.low %v839_v32, %v855_v34  ;;  %v873_v42 = vcombine.high %v839_v32, %v855_v34  ;;  %v1266_v31 = vld [vmem:[#allocation2] sm:$0xff] }
 0x318   : > { %v1082_v44 = vrot.slane %v1074_v35, %v3085_v2  ;;  %v1098_v45 = vrot.slane %v1090_v36, %v3085_v2  ;;  %v1089_v46 = vrot.slane %v1075_v37, %v3085_v2  ;;  %v1105_v47 = vrot.slane %v1091_v38, %v3085_v2 }
 0x319   : > { %v864_v48 = vrot.slane %v856_v39, %v3085_v2  ;;  %v871_v49 = vrot.slane %v857_v40, %v3085_v2  ;;  %v880_v50 = vrot.slane %v872_v41, %v3085_v2  ;;  %v887_v51 = vrot.slane %v873_v42, %v3085_v2 }
 0x31a   : > { %v1106_v52 = vcombine.low %v1082_v44, %v1098_v45  ;;  %v1108_v53 = vcombine.low %v1089_v46, %v1105_v47  ;;  %v1107_v8 = vcombine.high %v1082_v44, %v1098_v45  ;;  %v1109_v24 = vcombine.high %v1089_v46, %v1105_v47 }
 0x31b   : > { %v892_v54 = vcombine.low %v864_v48, %v871_v49  ;;  %v2276_v55 = vcombine.high %v864_v48, %v871_v49  ;;  %v908_v57 = vcombine.low %v880_v50, %v887_v51  ;;  %v2277_v59 = vcombine.high %v880_v50, %v887_v51 }
 0x31c   : > { %v1110_v60 = vpack.c.bf16 %v1106_v52, %v1106_v52  ;;  %v1112_v63 = vpack.c.bf16 %v1108_v53, %v1108_v53  ;;  %v1111_v19 = vpack.c.bf16 %v1107_v8, %v1107_v8  ;;  %v1113_v26 = vpack.c.bf16 %v1109_v24, %v1109_v24 }
 0x31d   : > { %v899_v1 = vrot.slane %v892_v54, %v3071_v58  ;;  %v907_v3 = vrot.slane %v2276_v55, %v3071_v58  ;;  %v915_v4 = vrot.slane %v908_v57, %v3071_v58  ;;  %v923_v5 = vrot.slane %v2277_v59, %v3071_v58 }
 0x31e   : > { %v1272_v6 = vsel %vm1267_vm2, %v1110_v60, 0  ;;  %v1364_v7 = vsel %vm1267_vm2, %v1112_v63, 0  ;;  %v1318_v23 = vsel %vm1267_vm2, %v1111_v19, 0  ;;  %v1410_v28 = vsel %vm1267_vm2, %v1113_v26, 0 }
 0x31f   : > { %v924_v9 = vcombine.low %v899_v1, %v907_v3  ;;  %v940_v10 = vcombine.low %v915_v4, %v923_v5  ;;  %2369 = vmatpush3.bf16.xpose.msra.mxu1 %v1272_v6  ;;  %2381 = vmatpush3.bf16.xpose.msra.mxu0 %v1364_v7  ;;  %v925_v11 = vcombine.high %v899_v1, %v907_v3 }
 0x320   : > { %2374 = vmatprep.subr.bf16.mxu1 %v2764_v15  ;;  %v941_v12 = vcombine.high %v915_v4, %v923_v5  ;;  %2392 = vmatprep.subr.bf16.mxu0 %v2764_v15 }
 0x321   : > { %v932_v13 = vrot.slane %v924_v9, %v3085_v2  ;;  %v948_v14 = vrot.slane %v940_v10, %v3085_v2  ;;  %v939_v16 = vrot.slane %v925_v11, %v3085_v2 }
 0x322   : > { %v955_v17 = vrot.slane %v941_v12, %v3085_v2 }
 0x323   : > { %v956_v18 = vcombine.low %v932_v13, %v948_v14  ;;  %v957_v25 = vcombine.high %v932_v13, %v948_v14 }
 0x324   : > { %v958_v20 = vcombine.low %v939_v16, %v955_v17  ;;  %v959_v29 = vcombine.high %v939_v16, %v955_v17 }
 0x325   : > { %v960_v21 = vpack.c.bf16 %v956_v18, %v956_v18  ;;  %v961_v27 = vpack.c.bf16 %v957_v25, %v957_v25 }
 0x326   : > { %v962_v22 = vpack.c.bf16 %v958_v20, %v958_v20  ;;  %v963_v30 = vpack.c.bf16 %v959_v29, %v959_v29 }
 0x327   : > { %2371 = vmatmul.mubr.msk.bf16.vlgmr.msra.gmra.mrb[8].mxu1 %vm1267_vm2, %v960_v21 }
 0x328   : > { %2383 = vmatmul.mubr.msk.bf16.vlgmr.msra.gmra.mrb[0].mxu0 %vm1267_vm2, %v962_v22  ;;  %2375 = vmatpush3.bf16.xpose.msra.mxu1 %v1318_v23 }
 0x329   : > { %2376 = vmatprep.mubr.msk.bf16.mxu1 %vm2765_vm1, %v2764_v15  ;;  %2386 = vmatprep.subr.bf16.mxu1 %v2764_v15 }
 0x32a   : > { %2394 = vmatprep.mubr.msk.bf16.mxu0 %vm2765_vm1, %v2764_v15 }
 0x32f   : > { %2377 = vmatmul.mubr.msk.bf16.vlgmr.msra.gmra.mrb[12].mxu1 %vm1267_vm2, %v961_v27 }
 0x330   : > { %2387 = vmatpush3.bf16.xpose.msra.mxu1 %v1410_v28  ;;  %2388 = vmatprep.mubr.msk.bf16.mxu1 %vm2765_vm1, %v2764_v15 }
 0x331   : > { %2398 = vmatprep.subr.bf16.mxu1 %v2764_v15 }
 0x337   : > { %2389 = vmatmul.mubr.msk.bf16.vlgmr.msra.gmra.mrb[16].mxu1 %vm1267_vm2, %v963_v30 }
 0x338   : > { %2400 = vmatprep.mubr.msk.bf16.mxu1 %vm2765_vm1, %v2764_v15 }
 0x3fa   : > { %v1308_v32 = vpop.f32.mrb[8].mxu1 }
 0x3fb   : > { %v1309_v33 = vadd.f32 %v1308_v32, %v1266_v31  ;;  %v1400_v34 = vpop.f32.mrb[0].mxu0  ;;  %v2372_v35 = vpop.f32.mrb[9].mxu1 }
 0x3fc   : > { %v2384_v36 = vpop.f32.mrb[1].mxu0  ;;  %v1311_v37 = vpop.f32.mrb[10].mxu1  ;;  %v1401_v38 = vadd.f32 %v1400_v34, %v1266_v31 }
 0x3fd   : > { %v1403_v39 = vpop.f32.mrb[2].mxu0  ;;  %v2373_v40 = vpop.f32.mrb[11].mxu1  ;;  %v1452_v41 = vsel %vm1267_vm2, %v1309_v33, -inf }
 0x3fe   : > { %v2385_v42 = vpop.f32.mrb[3].mxu0  ;;  %1453 = vmax.xlane.f32.xlu0 %v1452_v41  ;;  %v1458_v44 = vsel %vm1267_vm2, %v1401_v38, -inf }
 0x402   : > { %1459 = vmax.xlane.f32.xlu0 %v1458_v44  ;;  %v1354_v45 = vpop.f32.mrb[12].mxu1 }
 0x403   : > { %v1355_v46 = vadd.f32 %v1354_v45, %v1266_v31  ;;  %v2378_v47 = vpop.f32.mrb[13].mxu1 }
 0x404   : > { %v1357_v48 = vpop.f32.mrb[14].mxu1 }
 0x405   : > { %v2379_v49 = vpop.f32.mrb[15].mxu1  ;;  %v1455_v50 = vsel %vm1267_vm2, %v1355_v46, -inf }
 0x406   : > { %1456 = vmax.xlane.f32.xlu1 %v1455_v50 }
 0x40a   : > { %v1446_v51 = vpop.f32.mrb[16].mxu1 }
 0x40b   : > { %v1447_v52 = vadd.f32 %v1446_v51, %v1266_v31  ;;  %v2390_v53 = vpop.f32.mrb[17].mxu1 }
 0x40c   : > { %v1449_v54 = vpop.f32.mrb[18].mxu1 }
 0x40d   : > { %v2391_v55 = vpop.f32.mrb[19].mxu1  ;;  %v1461_v57 = vsel %vm1267_vm2, %v1447_v52, -inf }
 0x40e   : > { %1462 = vmax.xlane.f32.xlu0 %v1461_v57 }
 0x417   : > { %1116 = vrot.lane.b32.xlu1 %v3077_v61, %s2771_s29 }
 0x41b   : > { %1118 = vrot.lane.b32.xlu1 %v3069_v56, %s2771_s29 }
 0x48b   : > { %v1454_v59 = vpop.xlane.xlu0 %1453 }
 0x48c   : > { %v1464_v60 = vsub.f32 %v1309_v33, %v1454_v59 }
 0x48e   : > { %v1468_v63 = vmul.f32 1.442695, %v1464_v60 }
 0x48f   : > { %v1460_v56 = vpop.xlane.xlu0 %1459 }
 0x490   : > { %2569 = vpow2.f32 %v1468_v63  ;;  %v1466_v8 = vsub.f32 %v1401_v38, %v1460_v56 }
 0x492   : > { %v1472_v9 = vmul.f32 1.442695, %v1466_v8 }
 0x493   : > { %v1457_v1 = vpop.xlane.xlu1 %1456 }
 0x494   : > { %v1465_v3 = vsub.f32 %v1355_v46, %v1457_v1 }
 0x496   : > { %v1470_v4 = vmul.f32 1.442695, %v1465_v3 }
 0x498   : > { %2571 = vpow2.f32 %v1470_v4 }
 0x499   : > { %2573 = vpow2.f32 %v1472_v9 }
 0x49a   : > { %v3145_v5 = vpop.eup %2569 }
 0x49b   : > { %v1476_v6 = vsel %vm1267_vm2, %v3145_v5, 0.0  ;;  %v1463_v10 = vpop.xlane.xlu0 %1462 }
 0x49c   : > { %1477 = vadd.xlane.f32.xlu0 %v1476_v6  ;;  %v1467_v11 = vsub.f32 %v1447_v52, %v1463_v10 }
 0x49e   : > { %v1474_v12 = vmul.f32 1.442695, %v1467_v11 }
 0x4a0   : > { %2575 = vpow2.f32 %v1474_v12 }
 0x4a2   : > { %v3149_v7 = vpop.eup %2571 }
 0x4a3   : > { %v1479_v61 = vsel %vm1267_vm2, %v3149_v7, 0.0  ;;  %v3155_v13 = vpop.eup %2573 }
 0x4a4   : > { %1480 = vadd.xlane.f32.xlu1 %v1479_v61  ;;  %v1482_v14 = vsel %vm1267_vm2, %v3155_v13, 0.0 }
 0x4aa   : > { %v3159_v16 = vpop.eup %2575 }
 0x4b2   : > { %1114 = vrot.lane.b32.xlu0 %v3064_v43, %s2771_s29  ;;  %v1485_v43 = vsel %vm1267_vm2, %v3159_v16, 0.0 }
 0x4b5   : > { %1120 = vrot.lane.b32.xlu1 %v3079_v62, %s2771_s29  ;;  %v1117_v62 = vpop.permute.xlu1 %1116  ;;  %s3298_s29 = scalar_lea.hbm %s3404_s22, %s2312_s23 }
 0x4b9   : > { %v1119_v18 = vpop.permute.xlu1 %1118 }
 0x4d1   : > { %1483 = vadd.xlane.f32.xlu0 %v1482_v14 }
 0x4d9   : > { %1486 = vadd.xlane.f32.xlu1 %v1485_v43 }
 0x529   : > { %v1478_v17 = vpop.xlane.xlu0 %1477 }
 0x52a   : > { %2577 = vrcp.f32 %v1478_v17 }
 0x52d   : > { %v1115_v19 = vpop.permute.xlu0 %1114 }
 0x52e   : > { %v1126_v21 = vcombine.low %v1115_v19, %v1119_v18  ;;  %v1127_v22 = vcombine.high %v1115_v19, %v1119_v18 }
 0x530   : > { %v1134_v26 = vrot.slane %v1126_v21, %v3071_v58  ;;  %v1141_v27 = vrot.slane %v1127_v22, %v3071_v58 }
 0x531   : > { %v1481_v20 = vpop.xlane.xlu1 %1480 }
 0x532   : > { %2579 = vrcp.f32 %v1481_v20 }
 0x534   : > { %v2578_v51 = vpop.eup %2577 }
 0x535   : > { %v1121_v23 = vpop.permute.xlu1 %1120  ;;  %v1492_v3 = vmul.f32 %v2578_v51, %v3145_v5 }
 0x536   : > { %v1142_v24 = vcombine.low %v1117_v62, %v1121_v23  ;;  %v1143_v25 = vcombine.high %v1117_v62, %v1121_v23 }
 0x537   : > { %v1496_v11 = vpack.c.bf16 %v1492_v3, %v1492_v3 }
 0x538   : > { %v1150_v28 = vrot.slane %v1142_v24, %v3071_v58  ;;  %v1157_v29 = vrot.slane %v1143_v25, %v3071_v58 }
 0x53a   : > { %v1158_v30 = vcombine.low %v1134_v26, %v1150_v28  ;;  %v1159_v31 = vcombine.high %v1134_v26, %v1150_v28  ;;  %v1174_v32 = vcombine.low %v1141_v27, %v1157_v29  ;;  %v1175_v33 = vcombine.high %v1141_v27, %v1157_v29 }
 0x53c   : > { %v1166_v34 = vrot.slane %v1158_v30, %v3085_v2  ;;  %v1173_v35 = vrot.slane %v1159_v31, %v3085_v2  ;;  %v1182_v36 = vrot.slane %v1174_v32, %v3085_v2  ;;  %v1189_v37 = vrot.slane %v1175_v33, %v3085_v2  ;;  %v2580_v57 = vpop.eup %2579 }
 0x53d   : > { %v1493_v4 = vmul.f32 %v2580_v57, %v3149_v7 }
 0x53e   : > { %v1194_v38 = vcombine.low %v1166_v34, %v1173_v35  ;;  %v2280_v39 = vcombine.high %v1166_v34, %v1173_v35  ;;  %v1210_v40 = vcombine.low %v1182_v36, %v1189_v37  ;;  %v2281_v41 = vcombine.high %v1182_v36, %v1189_v37 }
 0x53f   : > { %v1497_v12 = vpack.c.bf16 %v1493_v4, %v1493_v4 }
 0x540   : > { %v1201_v42 = vrot.slane %v1194_v38, %v3071_v58  ;;  %v1209_v44 = vrot.slane %v2280_v39, %v3071_v58  ;;  %v1217_v45 = vrot.slane %v1210_v40, %v3071_v58  ;;  %v1225_v46 = vrot.slane %v2281_v41, %v3071_v58 }
 0x542   : > { %v1226_v47 = vcombine.low %v1201_v42, %v1209_v44  ;;  %v1242_v48 = vcombine.low %v1217_v45, %v1225_v46  ;;  %v1227_v49 = vcombine.high %v1201_v42, %v1209_v44  ;;  %v1243_v50 = vcombine.high %v1217_v45, %v1225_v46 }
 0x544   : > { %v1234_v52 = vrot.slane %v1226_v47, %v3085_v2  ;;  %v1250_v53 = vrot.slane %v1242_v48, %v3085_v2  ;;  %v1241_v54 = vrot.slane %v1227_v49, %v3085_v2  ;;  %v1257_v55 = vrot.slane %v1243_v50, %v3085_v2  ;;  %v2553_v49 = vld [vmem:[%s3355_s9] sm:$0xff]  }
 0x546   : > { %v1258_v59 = vcombine.low %v1234_v52, %v1250_v53  ;;  %v1259_v60 = vcombine.high %v1234_v52, %v1250_v53  ;;  %v1260_v63 = vcombine.low %v1241_v54, %v1257_v55  ;;  %v1261_v1 = vcombine.high %v1241_v54, %v1257_v55 }
 0x548   : > { %v1262_v6 = vpack.c.bf16 %v1258_v59, %v1258_v59  ;;  %v1263_v61 = vpack.c.bf16 %v1259_v60, %v1259_v60  ;;  %v1264_v9 = vpack.c.bf16 %v1260_v63, %v1260_v63  ;;  %v1265_v10 = vpack.c.bf16 %v1261_v1, %v1261_v1  ;;  %v2554_v60 = vld [vmem:[%s3355_s9 + $0x8] sm:$0xff]  }
 0x54a   : > { %v1505_v56 = vsel %vm1503_vm3, %v1262_v6, 0  ;;  %v1551_v8 = vsel %vm1503_vm3, %v1263_v61, 0  ;;  %v1597_v5 = vsel %vm1503_vm3, %v1264_v9, 0  ;;  %v1643_v7 = vsel %vm1503_vm3, %v1265_v10, 0 }
 0x54b   : > { %2393 = vmatpush3.bf16.msra.mxu0 %v1505_v56  ;;  %2399 = vmatpush3.bf16.msra.mxu1 %v1551_v8 }
 0x54c   : > { %2404 = vmatprep.subr.bf16.mxu0 %v2764_v15  ;;  %2410 = vmatprep.subr.bf16.mxu1 %v2764_v15 }
 0x54e   : > { %2395 = vmatmul.mubr.msk.bf16.vlgmr.msra.gmra.mrb[4].mxu0 %vm1267_vm2, %v1496_v11  ;;  %2401 = vmatmul.mubr.msk.bf16.vlgmr.msra.gmra.mrb[20].mxu1 %vm1267_vm2, %v1497_v12 }
 0x54f   : > { %2405 = vmatpush3.bf16.msra.mxu0 %v1597_v5  ;;  %2411 = vmatpush3.bf16.msra.mxu1 %v1643_v7 }
 0x550   : > { %2406 = vmatprep.mubr.msk.bf16.mxu0 %vm2765_vm1, %v2764_v15  ;;  %2412 = vmatprep.mubr.msk.bf16.mxu1 %vm2765_vm1, %v2764_v15 }
 0x551   : > { %2416 = vmatprep.subr.bf16.mxu0 %v2764_v15  ;;  %2424 = vmatprep.subr.bf16.mxu1 %v2764_v15 }
 0x55e   : > { %v1484_v14 = vpop.xlane.xlu0 %1483 }
 0x55f   : > { %2581 = vrcp.f32 %v1484_v14 }
 0x566   : > { %v1487_v43 = vpop.xlane.xlu1 %1486 }
 0x567   : > { %2583 = vrcp.f32 %v1487_v43 }
 0x569   : > { %v2582_v62 = vpop.eup %2581 }
 0x56a   : > { %v1494_v17 = vmul.f32 %v2582_v62, %v3155_v13 }
 0x56c   : > { %v1498_v18 = vpack.c.bf16 %v1494_v17, %v1494_v17 }
 0x56e   : > { %2407 = vmatmul.mubr.msk.bf16.vlgmr.msra.gmra.mrb[8].mxu0 %vm1267_vm2, %v1498_v18 }
 0x56f   : > { %2420 = vmatprep.mubr.msk.bf16.mxu0 %vm2765_vm1, %v2764_v15  ;;  %2417 = vmatpush3.bf16.msra.mxu0 %v2553_v49  ;;  %v2562_v49 = vld [vmem:[%s3361_s15 + $0x28] sm:$0xff]  }
 0x570   : > { %2418 = vmatprep.subr.bf16.mxu0 %v2764_v15 }
 0x571   : > { %v2584_v19 = vpop.eup %2583 }
 0x572   : > { %v1495_v20 = vmul.f32 %v2584_v19, %v3159_v16 }
 0x573   : > { %2419 = vmatpush3.bf16.msra.mxu0 %v2554_v60 }
 0x574   : > { %v1499_v21 = vpack.c.bf16 %v1495_v20, %v1495_v20  ;;  %2432 = vmatprep.subr.bf16.mxu0 %v2764_v15 }
 0x576   : > { %2413 = vmatmul.mubr.msk.bf16.vlgmr.msra.gmra.mrb[24].mxu1 %vm1267_vm2, %v1499_v21  ;;  %v2292_v21 = vld [vmem:[%s3356_s10] ss:$0 sm:$0xff] }
 0x577   : > { %2428 = vmatprep.mubr.msk.bf16.mxu1 %vm2765_vm1, %v2764_v15 }
 0x621   : > { %v1541_v22 = vpop.f32.mrb[4].mxu0  ;;  %v1587_v23 = vpop.f32.mrb[20].mxu1 }
 0x622   : > { %v2396_v24 = vpop.f32.mrb[5].mxu0  ;;  %v2402_v25 = vpop.f32.mrb[21].mxu1 }
 0x623   : > { %v1544_v13 = vpop.f32.mrb[6].mxu0  ;;  %v1590_v26 = vpop.f32.mrb[22].mxu1 }
 0x624   : > { %v2397_v27 = vpop.f32.mrb[7].mxu0  ;;  %v2403_v28 = vpop.f32.mrb[23].mxu1 }
 0x641   : > { %v1633_v29 = vpop.f32.mrb[8].mxu0 }
 0x642   : > { %v1685_v30 = vcombine.low %v1541_v22, %v1633_v29  ;;  %v1686_v31 = vcombine.high %v1541_v22, %v1633_v29  ;;  %v2408_v32 = vpop.f32.mrb[9].mxu0 }
 0x643   : > { %v1636_v33 = vpop.f32.mrb[10].mxu0 }
 0x644   : > { %v2409_v16 = vpop.f32.mrb[11].mxu0  ;;  %v1693_v39 = vrot.slane %v1685_v30, %v3071_v58  ;;  %v1700_v40 = vrot.slane %v1686_v31, %v3071_v58  ;;  %v2555_v33 = vld [vmem:[%s3359_s13] sm:$0xff]  }
 0x645   : > { %2425 = vmatpush3.bf16.msra.mxu1 %v2555_v33  ;;  %v2557_v16 = vld [vmem:[%s3361_s15] sm:$0xff]  }
 0x646   : > { %2426 = vmatprep.subr.bf16.mxu1 %v2764_v15 }
 0x649   : > { %v1679_v34 = vpop.f32.mrb[24].mxu1 }
 0x64a   : > { %v1701_v35 = vcombine.low %v1587_v23, %v1679_v34  ;;  %v1702_v36 = vcombine.high %v1587_v23, %v1679_v34  ;;  %v2414_v37 = vpop.f32.mrb[25].mxu1  ;;  %v2558_v34 = vld [vmem:[%s3361_s15 + $0x8] sm:$0xff]  }
 0x64b   : > { %v1682_v38 = vpop.f32.mrb[26].mxu1 }
 0x64c   : > { %v1709_v41 = vrot.slane %v1701_v35, %v3071_v58  ;;  %v1716_v42 = vrot.slane %v1702_v36, %v3071_v58  ;;  %v2415_v44 = vpop.f32.mrb[27].mxu1  ;;  %v2559_v35 = vld [vmem:[%s3361_s15 + $0x10] sm:$0xff]  }
 0x64e   : > { %v1717_v45 = vcombine.low %v1693_v39, %v1709_v41  ;;  %v1718_v46 = vcombine.high %v1693_v39, %v1709_v41  ;;  %v1733_v47 = vcombine.low %v1700_v40, %v1716_v42  ;;  %v1734_v48 = vcombine.high %v1700_v40, %v1716_v42  ;;  %v2296_v40 = vld [vmem:[%s3357_s11] ss:$0 sm:$0xff] }
 0x64f   : > { %v2297_v42 = vld [vmem:[%s3358_s12] ss:$0 sm:$0xff] }
 0x650   : > { %v1725_v50 = vrot.slane %v1717_v45, %v3085_v2  ;;  %v1732_v51 = vrot.slane %v1718_v46, %v3085_v2  ;;  %v1741_v52 = vrot.slane %v1733_v47, %v3085_v2  ;;  %v1748_v53 = vrot.slane %v1734_v48, %v3085_v2  ;;  %v2560_v47 = vld [vmem:[%s3361_s15 + $0x18] sm:$0xff]   ;;  %v2561_v48 = vld [vmem:[%s3361_s15 + $0x20] sm:$0xff]  }
 0x652   : > { %v1753_v54 = vcombine.low %v1725_v50, %v1732_v51  ;;  %v2290_v55 = vcombine.high %v1725_v50, %v1732_v51  ;;  %v1769_v57 = vcombine.low %v1741_v52, %v1748_v53  ;;  %v2291_v59 = vcombine.high %v1741_v52, %v1748_v53  ;;  %v2563_v50 = vld [vmem:[%s3361_s15 + $0x30] sm:$0xff]   ;;  %v2564_v51 = vld [vmem:[%s3361_s15 + $0x38] sm:$0xff]   ;;  %v2298_v52 = vld [vmem:[%s3360_s14] ss:$0 sm:$0xff] }
 0x654   : > { %v1760_v63 = vrot.slane %v1753_v54, %v3071_v58  ;;  %v1768_v1 = vrot.slane %v2290_v55, %v3071_v58  ;;  %v1776_v3 = vrot.slane %v1769_v57, %v3071_v58  ;;  %v1784_v4 = vrot.slane %v2291_v59, %v3071_v58 }
 0x656   : > { %v1786_v6 = vcombine.high %v1760_v63, %v1768_v1  ;;  %v1802_v61 = vcombine.high %v1776_v3, %v1784_v4  ;;  %v1785_v56 = vcombine.low %v1760_v63, %v1768_v1  ;;  %v1801_v8 = vcombine.low %v1776_v3, %v1784_v4 }
 0x658   : > { %v1800_v9 = vrot.slane %v1786_v6, %v3085_v2  ;;  %v1816_v10 = vrot.slane %v1802_v61, %v3085_v2  ;;  %v1793_v11 = vrot.slane %v1785_v56, %v3085_v2  ;;  %v1809_v12 = vrot.slane %v1801_v8, %v3085_v2  ;;  %v2302_v6 = vld [vmem:[%s3402_s18] ss:$0 sm:$0xff] }
 0x65a   : > { %v1819_v5 = vcombine.low %v1800_v9, %v1816_v10  ;;  %v1818_v7 = vcombine.high %v1793_v11, %v1809_v12  ;;  %v1820_v14 = vcombine.high %v1800_v9, %v1816_v10  ;;  %v1817_v43 = vcombine.low %v1793_v11, %v1809_v12 }
 0x65c   : > { %1826 = vrot.lane.b32.xlu1 %v1819_v5, %s2772_s1  ;;  %1822 = vrot.lane.b32.xlu0 %v1818_v7, %s2773_s21  ;;  %s2263_s1 = sshll.u32 %s617_s16, 3 }
 0x65d   : > { %s619_s0 = scalar_lea.vmem [#allocation8], %s2263_s1  ;;  %s2679_s1 = scalar_lea.vmem %s2678_s28, 256 }
 0x65e   : > { %s2136_s17 = sshll.u32 %s619_s0, 4  ;;  %s3300_s17 = int_to_ptr.vmem [resolvable:$true] %s2136_s17 }
 0x65f   : > { %s2673_s24 = scalar_lea.vmem %s3300_s17, 128  ;;  %p2680_p11 = scmp.lt.s32.totalorder %s3300_s17, %s2678_s28 }
 0x660   : > { %1830 = vrot.lane.b32.xlu0 %v1820_v14, %s2774_s6  ;;  %p2674_p13 = scmp.ne.s32.totalorder %s3300_s17, %s2673_s24  ;;  %p2681_p3 = scmp.lt.s32.totalorder %s2679_s1, %s2673_s24 }
 0x662   : > { %p2675_p8 = pnand %p2674_p13, %p3405_p4  ;;  %p2682_p5 = por %p2681_p3, %p2680_p11 }
 0x664   : > { %p2676_p10 = pneg %p2675_p8 }
 0x666   : > { %p2683_p6 = pnand %p2682_p5, %p2676_p10 }
 0x6ce   : > { %v1823_v58 = vpop.permute.xlu0 %1822  ;;  %v1827_v62 = vpop.permute.xlu1 %1826 }
 0x6cf   : > { %v1833_v17 = vsel %vm1267_vm2, %v1817_v43, %v1823_v58 }
 0x6d0   : > { %v1835_v19 = vsel %vm1834_vm4, %v1833_v17, %v1827_v62 }
 0x6d2   : > { %v1831_v18 = vpop.permute.xlu0 %1830 }
 0x6d3   : > { %v1837_v20 = vsel %vm1836_vm5, %v1835_v19, %v1831_v18 }
 0x6d4   : > { %v1838_v2 = vpack.c.bf16 %v1837_v20, %v1837_v20 }
 0x6d6   : > { %2421 = vmatmul.mubr.msk.bf16.vlgmr.msra.gmra.mrb[12].mxu0 %vm636_vm0, %v1838_v2 }
 0x6d7   : > { %2448 = vmatprep.mubr.msk.bf16.mxu0 %vm2765_vm1, %v2764_v15  ;;  %2433 = vmatpush3.bf16.msra.mxu0 %v2557_v16 }
 0x6d8   : > { %2434 = vmatprep.subr.bf16.mxu0 %v2764_v15 }
 0x6db   : > { %2435 = vmatpush3.bf16.msra.mxu0 %v2558_v34 }
 0x6dc   : > { %2436 = vmatprep.subr.bf16.mxu0 %v2764_v15 }
 0x6df   : > { %2437 = vmatpush3.bf16.msra.mxu0 %v2559_v35 }
 0x6e0   : > { %2438 = vmatprep.subr.bf16.mxu0 %v2764_v15 }
 0x6e3   : > { %2439 = vmatpush3.bf16.msra.mxu0 %v2560_v47 }
 0x6e4   : > { %2440 = vmatprep.subr.bf16.mxu0 %v2764_v15 }
 0x6e7   : > { %2441 = vmatpush3.bf16.msra.mxu0 %v2561_v48 }
 0x6e8   : > { %2442 = vmatprep.subr.bf16.mxu0 %v2764_v15 }
 0x6eb   : > { %2443 = vmatpush3.bf16.msra.mxu0 %v2562_v49 }
 0x6ec   : > { %2444 = vmatprep.subr.bf16.mxu0 %v2764_v15 }
 0x6ef   : > { %2445 = vmatpush3.bf16.msra.mxu0 %v2563_v50 }
 0x6f0   : > { %2446 = vmatprep.subr.bf16.mxu0 %v2764_v15 }
 0x6f3   : > { %2447 = vmatpush3.bf16.msra.mxu0 %v2564_v51 }
 0x7a9   : > { %v1899_v22 = vpop.f32.mrb[12].mxu0 }
 0x7aa   : > { %v1900_v23 = vadd.f32 %v2292_v21, %v1899_v22  ;;  %v2422_v24 = vpop.f32.mrb[13].mxu0 }
 0x7ab   : > { %v1902_v25 = vpop.f32.mrb[14].mxu0 }
 0x7ac   : > { %v3235_v13 = vadd.f32 %v1900_v23, %v3022_v0  ;;  %v2423_v26 = vpop.f32.mrb[15].mxu0  ;;  %v2556_v0 = vld [vmem:[%s3359_s13 + $0x8] sm:$0xff]  }
 0x7ad   : > { %2427 = vmatpush3.bf16.msra.mxu1 %v2556_v0 }
 0x7ae   : > { %v1908_v27 = vsel %vm636_vm0, %v3235_v13, 0.0 }
 0x7af   : > { %1909 = vadd.xlane.f32.xlu1 %v1908_v27 }
 0x83c   : > { %v1910_v28 = vpop.xlane.xlu1 %1909 }
 0x83d   : > { %v1911_v29 = vmul.f32 0.03125, %v1910_v28 }
 0x83f   : > { %v1912_v30 = vsub.f32 %v3235_v13, %v1911_v29 }
 0x841   : > { %v1913_v31 = vmul.f32 %v1912_v30, %v1912_v30 }
 0x843   : > { %v1914_v32 = vsel %vm636_vm0, %v1913_v31, 0.0 }
 0x844   : > { %1915 = vadd.xlane.f32.xlu0 %v1914_v32 }
 0x8d1   : > { %v1916_v36 = vpop.xlane.xlu0 %1915 }
 0x8d2   : > { %v1917_v37 = vmul.f32 0.03125, %v1916_v36 }
 0x8d4   : > { %v1918_v38 = vadd.f32 1e-05, %v1917_v37 }
 0x8d6   : > { %2585 = vrsqrt.f32 %v1918_v38 }
 0x8e0   : > { %v2586_v39 = vpop.eup %2585 }
 0x8e1   : > { %v1920_v41 = vmul.f32 %v2586_v39, %v1912_v30 }
 0x8e3   : > { %v1927_v44 = vmul.f32 %v2296_v40, %v1920_v41 }
 0x8e5   : > { %v1934_v45 = vadd.f32 %v2297_v42, %v1927_v44 }
 0x8e7   : > { %v1935_v46 = vpack.c.bf16 %v1934_v45, %v1934_v45 }
 0x8e9   : > { %2429 = vmatmul.mubr.msk.bf16.vlgmr.msra.gmra.mrb[28].mxu1 %vm636_vm0, %v1935_v46 }
 0x9bc   : > { %v1996_v53 = vpop.f32.mrb[28].mxu1 }
 0x9bd   : > { %v1997_v54 = vadd.f32 %v2298_v52, %v1996_v53  ;;  %v2430_v55 = vpop.f32.mrb[29].mxu1 }
 0x9be   : > { %v1999_v57 = vpop.f32.mrb[30].mxu1 }
 0x9bf   : > { %v2003_v59 = vmul.f32 0.70710677, %v1997_v54  ;;  %v2431_v60 = vpop.f32.mrb[31].mxu1  ;;  %v2002_v15 = vmul.f32 0.5, %v1997_v54 }
 0x9c1   : > { %2587 = verf.f32 %v2003_v59 }
 0x9cb   : > { %v2588_v63 = vpop.eup %2587 }
 0x9cc   : > { %v2005_v1 = vadd.f32 1.0, %v2588_v63 }
 0x9ce   : > { %v2006_v3 = vmul.f32 %v2005_v1, %v2002_v15 }
 0x9d0   : > { %v2007_v4 = vpack.c.bf16 %v2006_v3, %v2006_v3 }
 0x9d2   : > { %2449 = vmatmul.mubr.bf16.vlgmr.msra.gmra.mrb[16].mxu0 %v2007_v4 }
 0xaa5   : > { %v2113_v61 = vpop.f32.mrb[16].mxu0 }
 0xaa6   : > { %v2114_v56 = vadd.f32 %v2302_v6, %v2113_v61  ;;  %v2450_v8 = vpop.f32.mrb[17].mxu0 }
 0xaa7   : > { %v2116_v9 = vpop.f32.mrb[18].mxu0 }
 0xaa8   : > { %v2119_v10 = vadd.f32 %v2114_v56, %v3235_v13  ;;  %v2451_v11 = vpop.f32.mrb[19].mxu0 }
 0xaaa   : > { %2120 = vst.msk [vmem:[%s619_s0] sm:$0xff] %vm636_vm0, %v2119_v10 }
 0xaab   : > { %2686 = shalt.err (!%p2683_p6)
}
 0xaac   : > { %s2687_s16 = scalar_lea.hbm %s3298_s29, 128  ;;  %s2691_s18 = scalar_lea.hbm %s3404_s22, 256 }
 0xaad   : > { %p2688_p7 = scmp.ne.s32.totalorder %s3298_s29, %s2687_s16  ;;  %p2692_p0 = scmp.lt.u32.totalorder %s3298_s29, %s3404_s22 }
 0xaae   : > { %p2693_p2 = scmp.lt.u32.totalorder %s2691_s18, %s2687_s16  ;;  %p2695_p13 = scmp.lt.u32.totalorder %s2687_s16, %s3298_s29 }
 0xaaf   : > { %p2689_p9 = pnand %p2688_p7, %p3405_p4 }
 0xab0   : > { %p2694_p1 = por %p2693_p2, %p2692_p0 }
 0xab1   : > { %p2690_p12 = pneg %p2689_p9 }
 0xab2   : > { %p2696_p8 = por %p2695_p13, %p2694_p1 }
 0xab4   : > { %p2697_p10 = pnand %p2696_p8, %p2690_p12 }
 0xab6   : > { %2700 = shalt.err (!%p2697_p10)
}
 0xab7   : > { %2464 = dma.vmem_to_hbm [thread:$0]  (%p3405_p4), %s3300_s17, 128, %s3298_s29, %s2122_s27  }
 0xab8 PF: > { %s3406_s26 = sld [smem:[#allocation15_spill]]  ;;  %s3407_s19 = sld [smem:[#allocation12_spill]] }
 0xab9   : > { %s3408_s24 = sld [smem:[#allocation18_spill]] }
 0xabe   : > { %p2486_p11 = scmp.ge.s32.totalorder %s3406_s26, 2  ;;  %s2148_s20 = sand.u32 1, %s3407_s19  }
 0xabf   : > { %p3409_p3 = scmp.ne.s32.totalorder %s3408_s24, 0  ;;  %s2149_s28 = scalar_lea.sflag [#allocation4], %s2148_s20 }
 0xac1   : > { %p2477_p5 = pnand %p2486_p11, %p3409_p3 }
 0xac3   : > { %2734 = dma.done.wait (!%p2477_p5), %s2149_s28, 128  }
 0xac4   : > { %2736 = vsyncadd (!%p2477_p5), %s2149_s28, 4294967168  ;;  %s32_s29 = sadd.s32 1, %s3406_s26   ;;  %s3410_s1 = sld [smem:[#allocation13_spill]] }
 0xac5   : > { %p29_p6 = scmp.ge.s32.totalorder %s32_s29, 4   ;;  %s3411_s26 = sld [smem:[#allocation19_spill]] }
 0xac6   : > { %s3412_s27 = sld [smem:[#allocation14_spill]]  ;;  %s3413_s28 = sld [smem:[#allocation16_spill]] }
 0xac7   : > { %s3414_s24 = smov %s2743_s25  ;;  %31 = sbr.rel (!%p29_p6) target bundleno = 12 (0xc), region = 140 }
 0xaca   : > { %s3415_s25 = smov %s3410_s1 }
 0xace   :  { %2154 = vsyncpa [#allocation3], 1 }
 0xacf   :  { %2156 = vsyncpa [#allocation3 + $0x1], 1 }
 0xad0   :  { %2157 = vsyncpa [#allocation6], 1 }
 0xad1   :  { %2158 = vsyncpa [#allocation4], 1 }
 0xad2   :  { %2160 = vsyncpa [#allocation4 + $0x1], 1 }

</bundles_post_ra>
